<compile_context>
chip_gen: v7x
topology: tpu7x:2x2x1
jax: 0.10.0
libtpu: 0.0.40
codegen_flags: <defaults>
</compile_context>

<pallas_src>
from functools import partial

import jax
import jax.numpy as jnp
from jax.experimental import pallas as pl
from jax.experimental.pallas import tpu as pltpu

SQRT_2PI = (2.0 * 3.14159) ** 0.5  # matches the torch.jit.script gaussian() constant


# --------------------------------------------------------------------------------------
# Kernel
# --------------------------------------------------------------------------------------
def _positional_bias_kernel(posj_ref, posi_ref, mul_ref, bias_ref, pad_ref, seg_ref,
                            means_ref, nhv_ref,
                            w1_ref, b1_ref, w2_ref, b2_ref, wp_ref, bp_ref,
                            attn_ref, merge_ref, dpos_ref,
                            *, n_node, tile_i, eup_dtype):
    F = tile_i * n_node
    f32 = jnp.float32
    bf16 = jnp.bfloat16

    # ---- expand compact query positions [3, TILE_I] -> [3, F] via an indicator matmul
    # (indicator built in-kernel from 2-D iotas; replaces the O(nn^2) wrapper repeat).
    t_idx = jax.lax.broadcasted_iota(jnp.int32, (tile_i, F), 0)
    f_idx = jax.lax.broadcasted_iota(jnp.int32, (tile_i, F), 1)
    lo = t_idx * n_node
    rep = jnp.logical_and(f_idx >= lo, f_idx < lo + n_node).astype(f32)   # [TILE_I, F]
    pos_i = jnp.dot(posi_ref[0, 0], rep, preferred_element_type=f32)       # [3, F]

    # ---- pairwise geometry on lane-dense [*, F] rows (f = t*nn + j) ----
    d = posj_ref[0] - pos_i                                   # pos[j] - pos[i], [3, F]
    dx, dy, dz = d[0:1, :], d[1:2, :], d[2:3, :]
    dist = jnp.sqrt(dx * dx + dy * dy + dz * dz)              # [1, F]
    inv_d = pl.reciprocal(dist + 1e-5)                        # one divide, not three
    dpos_ref[0, 0] = d * inv_d                                # [3, F]

    # ---- GaussianLayer (coef folded into W1'/Wp' by the wrapper) ----
    xe = mul_ref[0, 0] * dist + bias_ref[0, 0]                # [1, F]
    z = xe - means_ref[...]                                   # [K, F], f32 accumulation
    arg = (z * z) * nhv_ref[...]                              # -0.5 * ((x-mu)/std)^2, f32
    g = jnp.exp(arg.astype(eup_dtype)).astype(bf16)           # [K, F] bf16, single live slab

    # ---- NonLinear (gbf_proj): gelu(W1' @ g + b1) -> W2 ----
    h = jnp.dot(w1_ref[...], g, preferred_element_type=f32) + b1_ref[...]       # [K, F]
    h = jax.nn.gelu(h.astype(eup_dtype), approximate=True).astype(bf16)         # EUP tanh
    attn = jnp.dot(w2_ref[...], h, preferred_element_type=f32) + b2_ref[...]    # [H, F]
    attn = jnp.where(pad_ref[0] > 0.5, -jnp.inf, attn)        # mask padded key nodes j
    attn_ref[0, :, 0, 0, :] = attn

    # ---- edge_proj, reordered as (Wp' @ g) @ seg: the F-length contraction is lane-dense,
    # only the tiny [E,F]@[F,TILE_I] stays narrow; pad mask folded into seg in the wrapper.
    ef = jnp.dot(wp_ref[...], g, preferred_element_type=f32)                    # [E, F]
    merge_ref[0, 0] = (jnp.dot(ef.astype(bf16), seg_ref[0],
                               preferred_element_type=f32) + bp_ref[...])       # [E, TILE_I]


# --------------------------------------------------------------------------------------
# Generation-aware sizing helpers
# --------------------------------------------------------------------------------------
def _vmem_plan():
    """(vmem_limit_bytes, tile_budget_bytes) from the device's VMEM capacity."""
    try:
        cap = int(pltpu.get_tpu_info().vmem_capacity_bytes)
    except Exception:
        cap = 64 << 20                       # conservative default = v7x per-TensorCore
    vmem_limit = min((cap * 3) // 4, 96 << 20)   # raise the scoped default, keep headroom
    return vmem_limit, max(vmem_limit - (4 << 20), 8 << 20)


def _transcendental_dtype():
    """bf16 EUP on v6e/v7x (halves the binding exp/tanh slot); f32 on v5e and earlier."""
    try:
        kind = jax.devices()[0].device_kind.lower()
    except Exception:
        kind = ""
    if any(gen in kind for gen in ("v2", "v3", "v4", "v5")):
        return jnp.float32
    return jnp.bfloat16


def _pick_tile_i(n_node, K, H, E, budget_bytes):
    """Largest TILE_I (<=32, divides n_node) whose per-step footprint fits the budget;
    prefers tiles with lane-dense F = TILE_I*n_node (multiple of 128)."""
    def footprint(t):
        F = t * n_node
        io = 2 * (12 * F + 12 * t            # posj (f32) + compact posi (double-buffered)
                  + 8 * F + 4 * F            # mul + bias + pad (f32)
                  + 2 * F * t                # seg (bf16)
                  + 4 * H * F + 4 * E * t    # attn + merge outputs
                  + 12 * F)                  # delta_pos output
        tmp = F * (8 * K + 6 * E + 12 * t) + (1 << 20)   # [K,F]/[E,F] slabs, iotas, slack
        return io + tmp

    cands = [t for t in range(1, min(n_node, 32) + 1) if n_node % t == 0]
    feasible = [t for t in cands if footprint(t) <= budget_bytes]
    if not feasible:
        return 1                              # never fall back to TILE_I = n_node
    lane_dense = [t for t in feasible if (t * n_node) % 128 == 0]
    return max(lane_dense) if lane_dense else max(feasible)


# --------------------------------------------------------------------------------------
# Wrapper
# --------------------------------------------------------------------------------------
def positional_bias_forward(pos, x, node_type_edge, params):
    ng, nn_, _ = pos.shape
    K = params['means'].shape[-1]
    H = params['w2'].shape[0]
    E = params['wp'].shape[0]
    f32 = jnp.float32
    bf16 = jnp.bfloat16

    vmem_limit, tile_budget = _vmem_plan()
    TILE_I = _pick_tile_i(nn_, K, H, E, tile_budget)
    n_tiles = nn_ // TILE_I
    F = TILE_I * nn_
    eup_dtype = _transcendental_dtype()

    # --- plain-JAX glue ---
    # TODO(synk): the data-dependent edge-type embedding gather (mul/bias over
    # node_type_edge) has no clean BlockSpec form; it stays in XLA.
    et = node_type_edge.astype(jnp.int32)
    mul_sum = params['mul_w'][et, 0].sum(-1).astype(f32)          # [ng, nn, nn]
    bias_sum = params['bias_w'][et, 0].sum(-1).astype(f32)        # [ng, nn, nn]
    pad = jnp.all(x == 0, axis=-1).astype(f32)                    # [ng, nn]

    # flat pair axis f = t*nn + j (t = query row inside the tile, j = key node)
    pos_f = pos.astype(f32)
    posj_flat = jnp.tile(jnp.transpose(pos_f, (0, 2, 1)), (1, 1, TILE_I))         # [ng,3,F]
    posi_c = jnp.transpose(pos_f.reshape(ng, n_tiles, TILE_I, 3), (0, 1, 3, 2))   # [ng,nt,3,TILE_I]
    mul_flat = mul_sum.reshape(ng, n_tiles, 1, F)                 # free contiguous reshapes
    bias_flat = bias_sum.reshape(ng, n_tiles, 1, F)
    pad_flat = jnp.tile(pad, (1, TILE_I))[:, None, :]             # [ng, 1, F], pad[j]

    # per-graph segment-sum matrix: seg[f, t] = (f // nn == t) * (1 - pad[j])
    row_blk = (jnp.arange(F, dtype=jnp.int32) // nn_)[:, None]
    col = jnp.arange(TILE_I, dtype=jnp.int32)[None, :]
    seg_base = (row_blk == col).astype(f32)                       # [F, TILE_I]
    notpad_f = jnp.tile(1.0 - pad, (1, TILE_I))                   # [ng, F]
    seg_m = (seg_base[None] * notpad_f[:, :, None]).astype(bf16)  # [ng, F, TILE_I]

    # constants: reciprocals precomputed once; Gaussian coef folded into W1'/Wp';
    # weights cast to bf16 for the MXU.
    means = params['means'].reshape(K, 1).astype(f32)
    std = jnp.abs(params['stds'].reshape(K, 1).astype(f32)) + 0.01
    inv_std = 1.0 / std
    neg_half_ivar = (-0.5) * inv_std * inv_std                    # [K, 1]
    coef = (inv_std / SQRT_2PI).reshape(1, K)
    w1p = (params['w1'].astype(f32) * coef).astype(bf16)          # W1 * coef (input dim)
    wpp = (params['wp'].astype(f32) * coef).astype(bf16)          # Wp * coef (input dim)
    w2 = params['w2'].astype(bf16)
    b1 = params['b1'].reshape(K, 1).astype(f32)
    b2 = params['b2'].reshape(H, 1).astype(f32)
    bp = params['bp'].reshape(E, 1).astype(f32)

    c2 = lambda g, it: (0, 0)
    in_specs = [
        pl.BlockSpec((1, 3, F), lambda g, it: (g, 0, 0)),            # posj_flat
        pl.BlockSpec((1, 1, 3, TILE_I), lambda g, it: (g, it, 0, 0)),  # posi (compact)
        pl.BlockSpec((1, 1, 1, F), lambda g, it: (g, it, 0, 0)),     # mul (per-tile rows)
        pl.BlockSpec((1, 1, 1, F), lambda g, it: (g, it, 0, 0)),     # bias (per-tile rows)
        pl.BlockSpec((1, 1, F), lambda g, it: (g, 0, 0)),            # pad_flat
        pl.BlockSpec((1, F, TILE_I), lambda g, it: (g, 0, 0)),       # seg (bf16, per-graph)
        pl.BlockSpec((K, 1), c2),                                    # means
        pl.BlockSpec((K, 1), c2),                                    # -0.5/std^2
        pl.BlockSpec((K, K), c2),                                    # W1' (bf16)
        pl.BlockSpec((K, 1), c2),                                    # b1
        pl.BlockSpec((H, K), c2),                                    # W2 (bf16)
        pl.BlockSpec((H, 1), c2),                                    # b2
        pl.BlockSpec((E, K), c2),                                    # Wp' (bf16)
        pl.BlockSpec((E, 1), c2),                                    # bp
    ]
    out_specs = [
        pl.BlockSpec((1, H, 1, 1, F), lambda g, it: (g, 0, it, 0, 0)),   # attn (lane-dense)
        pl.BlockSpec((1, 1, E, TILE_I), lambda g, it: (g, it, 0, 0)),    # merge features
        pl.BlockSpec((1, 1, 3, F), lambda g, it: (g, it, 0, 0)),         # delta_pos (flat)
    ]
    out_shapes = (
        jax.ShapeDtypeStruct((ng, H, n_tiles, 1, F), f32),
        jax.ShapeDtypeStruct((ng, n_tiles, E, TILE_I), f32),
        jax.ShapeDtypeStruct((ng, n_tiles, 3, F), f32),
    )

    kernel = partial(_positional_bias_kernel, n_node=nn_, tile_i=TILE_I, eup_dtype=eup_dtype)
    attn_flat, merge_out, dpos_flat = pl.pallas_call(
        kernel,
        out_shape=out_shapes,
        grid_spec=pltpu.PrefetchScalarGridSpec(
            num_scalar_prefetch=0,
            grid=(ng, n_tiles),          # keep ng*n_tiles even for v7x's two TensorCores
            in_specs=in_specs,
            out_specs=out_specs,
        ),
        compiler_params=pltpu.CompilerParams(
            dimension_semantics=("parallel", "parallel"),
            vmem_limit_bytes=vmem_limit),
    )(posj_flat, posi_c, mul_flat, bias_flat, pad_flat, seg_m,
      means, neg_half_ivar, w1p, b1, w2, b2, wpp, bp)

    # Final layouts: the attn reshape is contiguous (free, no transpose pass).
    graph_attn_bias = attn_flat.reshape(ng, H, nn_, nn_)
    merge_edge_features = jnp.transpose(merge_out, (0, 1, 3, 2)).reshape(ng, nn_, E)
    # TODO(synk): this transpose is an O(3*nn^2) HBM pass per graph; consumers that accept
    # [ng, 3, nn, nn] (or the flat tile layout) should skip it.
    delta_pos = jnp.transpose(
        dpos_flat.reshape(ng, n_tiles, 3, TILE_I, nn_), (0, 1, 3, 4, 2)
    ).reshape(ng, nn_, nn_, 3)
    return graph_attn_bias, merge_edge_features, delta_pos


# --------------------------------------------------------------------------------------
# Pure-JAX reference (f32, exact-erf GELU) mirror of the PyTorch forward
# --------------------------------------------------------------------------------------
def reference(pos, x, node_type_edge, params):
    pad = jnp.all(x == 0, axis=-1)                                   # [ng, nn]
    delta_pos = pos[:, None, :, :] - pos[:, :, None, :]              # pos[j] - pos[i]
    dist = jnp.linalg.norm(delta_pos, axis=-1)
    delta_pos = delta_pos / (dist[..., None] + 1e-5)

    et = node_type_edge.astype(jnp.int32)
    mul = params['mul_w'][et, 0].sum(-1)[..., None]
    bias = params['bias_w'][et, 0].sum(-1)[..., None]
    xg = mul * dist[..., None] + bias                                # [ng, nn, nn, 1]
    mean = params['means'].reshape(-1)
    std = jnp.abs(params['stds'].reshape(-1)) + 0.01
    ef = jnp.exp(-0.5 * ((xg - mean) / std) ** 2) / (SQRT_2PI * std)  # [ng, nn, nn, K]

    h = jax.nn.gelu(ef @ params['w1'].T + params['b1'], approximate=False)
    gbf_res = h @ params['w2'].T + params['b2']                      # [ng, nn, nn, H]
    gab = jnp.transpose(gbf_res, (0, 3, 1, 2))
    gab = jnp.where(pad[:, None, None, :], -jnp.inf, gab)

    ef_m = jnp.where(pad[:, None, :, None], 0.0, ef)
    sum_ef = ef_m.sum(axis=-2)
    merge = sum_ef @ params['wp'].T + params['bp']
    return gab, merge, delta_pos


if __name__ == "__main__":
    key = jax.random.PRNGKey(0)
    ng, nn_, Fdim = 2, 16, 4
    K, H, E = 128, 8, 32          # num_kernel, rpe_heads (shared), embed_dim
    num_edges = 512 * 3
    keys = jax.random.split(key, 11)
    s = 1.0 / jnp.sqrt(jnp.float32(K))
    params = dict(
        means=jax.random.uniform(keys[0], (1, K), jnp.float32, 0.0, 3.0),
        stds=jax.random.uniform(keys[1], (1, K), jnp.float32, 0.0, 3.0),
        mul_w=jnp.ones((num_edges, 1), jnp.float32),    # nn.init.constant_(mul.weight, 1)
        bias_w=jnp.zeros((num_edges, 1), jnp.float32),  # nn.init.constant_(bias.weight, 0)
        w1=jax.random.uniform(keys[2], (K, K), jnp.float32, -1.0, 1.0) * s,
        b1=jax.random.uniform(keys[3], (K,), jnp.float32, -1.0, 1.0) * s,
        w2=jax.random.uniform(keys[4], (H, K), jnp.float32, -1.0, 1.0) * s,
        b2=jax.random.uniform(keys[5], (H,), jnp.float32, -1.0, 1.0) * s,
        wp=jax.random.uniform(keys[6], (E, K), jnp.float32, -1.0, 1.0) * s,
        bp=jax.random.uniform(keys[7], (E,), jnp.float32, -1.0, 1.0) * s,
    )

    pos = jax.random.uniform(keys[8], (ng, nn_, 3), jnp.float32, 0.0, 3.0)
    x = jax.random.normal(keys[9], (ng, nn_, Fdim), jnp.float32)
    x = x.at[1, -3:, :].set(0.0)   # last 3 nodes of graph 1 are padding
    node_type_edge = jax.random.randint(keys[10], (ng, nn_, nn_, 2), 1, num_edges)

    gab, mef, dpos = positional_bias_forward(pos, x, node_type_edge, params)
    jax.block_until_ready((gab, mef, dpos))

    r_gab, r_mef, r_dpos = reference(pos, x, node_type_edge, params)
    fix = lambda a: jnp.where(jnp.isinf(a), -1e30, a)
    assert gab.shape == (ng, H, nn_, nn_)
    assert mef.shape == (ng, nn_, E)
    assert dpos.shape == (ng, nn_, nn_, 3)
    # bf16 MXU operands + bf16 EUP (v6e/v7x) + tanh GELU in the kernel vs f32 / exact-erf
    # reference -> 5e-2 tolerance on the projected outputs; delta_pos is full f32.
    assert bool(jnp.allclose(fix(gab), fix(r_gab), atol=5e-2, rtol=5e-2))
    assert bool(jnp.allclose(mef, r_mef, atol=5e-2, rtol=5e-2))
    assert bool(jnp.allclose(dpos, r_dpos, atol=1e-3, rtol=1e-3))
    print("KERNEL_OK")
</pallas_src>

<mosaic_0001>
module attributes {stable_mosaic.version = 11 : i64} {
  func.func @_positional_bias_kernel(%arg0: i32, %arg1: i32, %arg2: memref<1x3x256xf32, #tpu.memory_space<vmem>>, %arg3: memref<1x1x3x16xf32, #tpu.memory_space<vmem>>, %arg4: memref<1x1x1x256xf32, #tpu.memory_space<vmem>>, %arg5: memref<1x1x1x256xf32, #tpu.memory_space<vmem>>, %arg6: memref<1x1x256xf32, #tpu.memory_space<vmem>>, %arg7: memref<1x256x16xbf16, #tpu.memory_space<vmem>>, %arg8: memref<128x1xf32, #tpu.memory_space<vmem>>, %arg9: memref<128x1xf32, #tpu.memory_space<vmem>>, %arg10: memref<128x128xbf16, #tpu.memory_space<vmem>>, %arg11: memref<128x1xf32, #tpu.memory_space<vmem>>, %arg12: memref<8x128xbf16, #tpu.memory_space<vmem>>, %arg13: memref<8x1xf32, #tpu.memory_space<vmem>>, %arg14: memref<32x128xbf16, #tpu.memory_space<vmem>>, %arg15: memref<32x1xf32, #tpu.memory_space<vmem>>, %arg16: memref<1x8x1x1x256xf32, #tpu.memory_space<vmem>>, %arg17: memref<1x1x32x16xf32, #tpu.memory_space<vmem>>, %arg18: memref<1x1x3x256xf32, #tpu.memory_space<vmem>>) attributes {dimension_semantics = [#tpu.dimension_semantics<parallel>, #tpu.dimension_semantics<parallel>], iteration_bounds = array<i64: 2, 1>, scalar_prefetch = 0 : i64, scratch_operands = 0 : i64, tpu.core_type = #tpu.core_type<tc>, window_params = [{transform_indices = @transform_0, window_bounds = array<i64: 1, 3, 256>}, {transform_indices = @transform_1, window_bounds = array<i64: 1, 1, 3, 16>}, {transform_indices = @transform_2, window_bounds = array<i64: 1, 1, 1, 256>}, {transform_indices = @transform_3, window_bounds = array<i64: 1, 1, 1, 256>}, {transform_indices = @transform_4, window_bounds = array<i64: 1, 1, 256>}, {transform_indices = @transform_5, window_bounds = array<i64: 1, 256, 16>}, {pipeline_mode = #tpu.pipeline_mode<synchronous>, transform_indices = @transform_6, window_bounds = array<i64: 128, 1>}, {pipeline_mode = #tpu.pipeline_mode<synchronous>, transform_indices = @transform_7, window_bounds = array<i64: 128, 1>}, {pipeline_mode = #tpu.pipeline_mode<synchronous>, transform_indices = @transform_8, window_bounds = array<i64: 128, 128>}, {pipeline_mode = #tpu.pipeline_mode<synchronous>, transform_indices = @transform_9, window_bounds = array<i64: 128, 1>}, {pipeline_mode = #tpu.pipeline_mode<synchronous>, transform_indices = @transform_10, window_bounds = array<i64: 8, 128>}, {pipeline_mode = #tpu.pipeline_mode<synchronous>, transform_indices = @transform_11, window_bounds = array<i64: 8, 1>}, {pipeline_mode = #tpu.pipeline_mode<synchronous>, transform_indices = @transform_12, window_bounds = array<i64: 32, 128>}, {pipeline_mode = #tpu.pipeline_mode<synchronous>, transform_indices = @transform_13, window_bounds = array<i64: 32, 1>}, {transform_indices = @transform_14, window_bounds = array<i64: 1, 8, 1, 1, 256>}, {transform_indices = @transform_15, window_bounds = array<i64: 1, 1, 32, 16>}, {transform_indices = @transform_16, window_bounds = array<i64: 1, 1, 3, 256>}]} {
    %0 = tpu.iota {dimensions = array<i32: 0>} : vector<16x256xi32>
    %1 = tpu.iota {dimensions = array<i32: 1>} : vector<16x256xi32>
    %c16_i32 = arith.constant 16 : i32
    %2 = vector.broadcast %c16_i32 : i32 to vector<16x256xi32>
    %3 = arith.muli %0, %2 : vector<16x256xi32>
    %4 = arith.cmpi sge, %1, %3 : vector<16x256xi32>
    %c16_i32_0 = arith.constant 16 : i32
    %5 = vector.broadcast %c16_i32_0 : i32 to vector<16x256xi32>
    %6 = arith.addi %3, %5 : vector<16x256xi32>
    %7 = arith.cmpi slt, %1, %6 : vector<16x256xi32>
    %8 = arith.andi %4, %7 : vector<16x256xi1>
    %9 = arith.extui %8 : vector<16x256xi1> to vector<16x256xi32>
    %10 = arith.sitofp %9 : vector<16x256xi32> to vector<16x256xf32>
    %c0 = arith.constant 0 : index
    %c0_1 = arith.constant 0 : index
    %c0_2 = arith.constant 0 : index
    %c0_3 = arith.constant 0 : index
    %11 = vector.load %arg3[%c0, %c0_1, %c0_2, %c0_3] : memref<1x1x3x16xf32, #tpu.memory_space<vmem>>, vector<1x1x3x16xf32>
    %12 = vector.shape_cast %11 : vector<1x1x3x16xf32> to vector<3x16xf32>
    %cst = arith.constant dense<0.000000e+00> : vector<3x256xf32>
    %13 = tpu.matmul %12, %10, %cst {dimension_numbers = #tpu.dot_dimension_numbers<[1], [0], [0], [1], [0, 0, 1, 1], [], []>} : vector<3x16xf32>, vector<16x256xf32>, vector<3x256xf32> -> vector<3x256xf32>
    %c0_4 = arith.constant 0 : index
    %c0_5 = arith.constant 0 : index
    %c0_6 = arith.constant 0 : index
    %14 = vector.load %arg2[%c0_4, %c0_5, %c0_6] : memref<1x3x256xf32, #tpu.memory_space<vmem>>, vector<1x3x256xf32>
    %15 = vector.shape_cast %14 : vector<1x3x256xf32> to vector<3x256xf32>
    %16 = arith.subf %15, %13 : vector<3x256xf32>
    %17 = vector.extract_strided_slice %16 {offsets = [0, 0], sizes = [1, 256], strides = [1, 1]} : vector<3x256xf32> to vector<1x256xf32>
    %18 = vector.extract_strided_slice %16 {offsets = [1, 0], sizes = [1, 256], strides = [1, 1]} : vector<3x256xf32> to vector<1x256xf32>
    %19 = vector.extract_strided_slice %16 {offsets = [2, 0], sizes = [1, 256], strides = [1, 1]} : vector<3x256xf32> to vector<1x256xf32>
    %20 = arith.mulf %17, %17 : vector<1x256xf32>
    %21 = arith.mulf %18, %18 : vector<1x256xf32>
    %22 = arith.addf %20, %21 : vector<1x256xf32>
    %23 = arith.mulf %19, %19 : vector<1x256xf32>
    %24 = arith.addf %22, %23 : vector<1x256xf32>
    %25 = math.sqrt %24 : vector<1x256xf32>
    %cst_7 = arith.constant 9.99999974E-6 : f32
    %26 = vector.broadcast %cst_7 : f32 to vector<1x256xf32>
    %27 = arith.addf %25, %26 : vector<1x256xf32>
    %28 = tpu.reciprocal %27 : vector<1x256xf32> -> vector<1x256xf32>
    %29 = vector.broadcast %28 : vector<1x256xf32> to vector<3x256xf32>
    %30 = arith.mulf %16, %29 : vector<3x256xf32>
    %c0_8 = arith.constant 0 : index
    %c0_9 = arith.constant 0 : index
    %c0_10 = arith.constant 0 : index
    %c0_11 = arith.constant 0 : index
    %31 = vector.load %arg18[%c0_8, %c0_9, %c0_10, %c0_11] : memref<1x1x3x256xf32, #tpu.memory_space<vmem>>, vector<1x1x3x256xf32>
    %32 = vector.shape_cast %31 : vector<1x1x3x256xf32> to vector<3x256xf32>
    %33 = vector.shape_cast %30 : vector<3x256xf32> to vector<1x1x3x256xf32>
    tpu.vector_store %arg18[%c0_8, %c0_9, %c0_10, %c0_11], %33 {strides = array<i32>} : memref<1x1x3x256xf32, #tpu.memory_space<vmem>>, vector<1x1x3x256xf32>,
    %c0_12 = arith.constant 0 : index
    %c0_13 = arith.constant 0 : index
    %c0_14 = arith.constant 0 : index
    %c0_15 = arith.constant 0 : index
    %34 = vector.load %arg4[%c0_12, %c0_13, %c0_14, %c0_15] : memref<1x1x1x256xf32, #tpu.memory_space<vmem>>, vector<1x1x1x256xf32>
    %35 = vector.shape_cast %34 : vector<1x1x1x256xf32> to vector<1x256xf32>
    %36 = arith.mulf %35, %25 : vector<1x256xf32>
    %c0_16 = arith.constant 0 : index
    %c0_17 = arith.constant 0 : index
    %c0_18 = arith.constant 0 : index
    %c0_19 = arith.constant 0 : index
    %37 = vector.load %arg5[%c0_16, %c0_17, %c0_18, %c0_19] : memref<1x1x1x256xf32, #tpu.memory_space<vmem>>, vector<1x1x1x256xf32>
    %38 = vector.shape_cast %37 : vector<1x1x1x256xf32> to vector<1x256xf32>
    %39 = arith.addf %36, %38 : vector<1x256xf32>
    %c0_20 = arith.constant 0 : index
    %c0_21 = arith.constant 0 : index
    %40 = vector.load %arg8[%c0_20, %c0_21] : memref<128x1xf32, #tpu.memory_space<vmem>>, vector<128x1xf32>
    %41 = vector.broadcast %39 : vector<1x256xf32> to vector<128x256xf32>
    %42 = vector.broadcast %40 : vector<128x1xf32> to vector<128x256xf32>
    %43 = arith.subf %41, %42 : vector<128x256xf32>
    %44 = arith.mulf %43, %43 : vector<128x256xf32>
    %c0_22 = arith.constant 0 : index
    %c0_23 = arith.constant 0 : index
    %45 = vector.load %arg9[%c0_22, %c0_23] : memref<128x1xf32, #tpu.memory_space<vmem>>, vector<128x1xf32>
    %46 = vector.broadcast %45 : vector<128x1xf32> to vector<128x256xf32>
    %47 = arith.mulf %44, %46 : vector<128x256xf32>
    %48 = arith.truncf %47 : vector<128x256xf32> to vector<128x256xbf16>
    %49 = math.exp %48 : vector<128x256xbf16>
    %c0_24 = arith.constant 0 : index
    %c0_25 = arith.constant 0 : index
    %50 = vector.load %arg10[%c0_24, %c0_25] : memref<128x128xbf16, #tpu.memory_space<vmem>>, vector<128x128xbf16>
    %cst_26 = arith.constant dense<0.000000e+00> : vector<128x256xf32>
    %51 = tpu.matmul %50, %49, %cst_26 {dimension_numbers = #tpu.dot_dimension_numbers<[1], [0], [0], [1], [0, 0, 1, 1], [], []>} : vector<128x128xbf16>, vector<128x256xbf16>, vector<128x256xf32> -> vector<128x256xf32>
    %c0_27 = arith.constant 0 : index
    %c0_28 = arith.constant 0 : index
    %52 = vector.load %arg11[%c0_27, %c0_28] : memref<128x1xf32, #tpu.memory_space<vmem>>, vector<128x1xf32>
    %53 = vector.broadcast %52 : vector<128x1xf32> to vector<128x256xf32>
    %54 = arith.addf %51, %53 : vector<128x256xf32>
    %55 = arith.truncf %54 : vector<128x256xf32> to vector<128x256xbf16>
    %56 = arith.mulf %55, %55 : vector<128x256xbf16>
    %57 = arith.mulf %55, %56 : vector<128x256xbf16>
    %cst_29 = arith.constant 4.467770e-02 : bf16
    %58 = vector.broadcast %cst_29 : bf16 to vector<128x256xbf16>
    %59 = arith.mulf %58, %57 : vector<128x256xbf16>
    %60 = arith.addf %55, %59 : vector<128x256xbf16>
    %cst_30 = arith.constant 7.968750e-01 : bf16
    %61 = vector.broadcast %cst_30 : bf16 to vector<128x256xbf16>
    %62 = arith.mulf %61, %60 : vector<128x256xbf16>
    %63 = math.tanh %62 : vector<128x256xbf16>
    %cst_31 = arith.constant 1.000000e+00 : bf16
    %64 = vector.broadcast %cst_31 : bf16 to vector<128x256xbf16>
    %65 = arith.addf %64, %63 : vector<128x256xbf16>
    %cst_32 = arith.constant 5.000000e-01 : bf16
    %66 = vector.broadcast %cst_32 : bf16 to vector<128x256xbf16>
    %67 = arith.mulf %66, %65 : vector<128x256xbf16>
    %68 = arith.mulf %55, %67 : vector<128x256xbf16>
    %c0_33 = arith.constant 0 : index
    %c0_34 = arith.constant 0 : index
    %69 = vector.load %arg12[%c0_33, %c0_34] : memref<8x128xbf16, #tpu.memory_space<vmem>>, vector<8x128xbf16>
    %cst_35 = arith.constant dense<0.000000e+00> : vector<8x256xf32>
    %70 = tpu.matmul %69, %68, %cst_35 {dimension_numbers = #tpu.dot_dimension_numbers<[1], [0], [0], [1], [0, 0, 1, 1], [], []>} : vector<8x128xbf16>, vector<128x256xbf16>, vector<8x256xf32> -> vector<8x256xf32>
    %c0_36 = arith.constant 0 : index
    %c0_37 = arith.constant 0 : index
    %71 = vector.load %arg13[%c0_36, %c0_37] : memref<8x1xf32, #tpu.memory_space<vmem>>, vector<8x1xf32>
    %72 = vector.broadcast %71 : vector<8x1xf32> to vector<8x256xf32>
    %73 = arith.addf %70, %72 : vector<8x256xf32>
    %c0_38 = arith.constant 0 : index
    %c0_39 = arith.constant 0 : index
    %c0_40 = arith.constant 0 : index
    %74 = vector.load %arg6[%c0_38, %c0_39, %c0_40] : memref<1x1x256xf32, #tpu.memory_space<vmem>>, vector<1x1x256xf32>
    %75 = vector.shape_cast %74 : vector<1x1x256xf32> to vector<1x256xf32>
    %cst_41 = arith.constant 5.000000e-01 : f32
    %76 = vector.broadcast %cst_41 : f32 to vector<1x256xf32>
    %77 = arith.cmpf ogt, %75, %76 : vector<1x256xf32>
    %cst_42 = arith.constant 0xFF800000 : f32
    %78 = vector.shape_cast %77 : vector<1x256xi1> to vector<1x256xi1>
    %79 = vector.broadcast %78 : vector<1x256xi1> to vector<8x256xi1>
    %80 = vector.broadcast %cst_42 : f32 to vector<8x256xf32>
    %81 = arith.select %79, %80, %73 : vector<8x256xi1>, vector<8x256xf32>
    %c0_43 = arith.constant 0 : index
    %c0_44 = arith.constant 0 : index
    %c0_45 = arith.constant 0 : index
    %c0_46 = arith.constant 0 : index
    %c0_47 = arith.constant 0 : index
    %82 = vector.load %arg16[%c0_43, %c0_44, %c0_45, %c0_46, %c0_47] : memref<1x8x1x1x256xf32, #tpu.memory_space<vmem>>, vector<1x8x1x1x256xf32>
    %83 = vector.shape_cast %82 : vector<1x8x1x1x256xf32> to vector<8x256xf32>
    %84 = vector.shape_cast %81 : vector<8x256xf32> to vector<1x8x1x1x256xf32>
    tpu.vector_store %arg16[%c0_43, %c0_44, %c0_45, %c0_46, %c0_47], %84 {strides = array<i32>} : memref<1x8x1x1x256xf32, #tpu.memory_space<vmem>>, vector<1x8x1x1x256xf32>,
    %c0_48 = arith.constant 0 : index
    %c0_49 = arith.constant 0 : index
    %85 = vector.load %arg14[%c0_48, %c0_49] : memref<32x128xbf16, #tpu.memory_space<vmem>>, vector<32x128xbf16>
    %cst_50 = arith.constant dense<0.000000e+00> : vector<32x256xf32>
    %86 = tpu.matmul %85, %49, %cst_50 {dimension_numbers = #tpu.dot_dimension_numbers<[1], [0], [0], [1], [0, 0, 1, 1], [], []>} : vector<32x128xbf16>, vector<128x256xbf16>, vector<32x256xf32> -> vector<32x256xf32>
    %87 = arith.truncf %86 : vector<32x256xf32> to vector<32x256xbf16>
    %c0_51 = arith.constant 0 : index
    %c0_52 = arith.constant 0 : index
    %c0_53 = arith.constant 0 : index
    %88 = vector.load %arg7[%c0_51, %c0_52, %c0_53] : memref<1x256x16xbf16, #tpu.memory_space<vmem>>, vector<1x256x16xbf16>
    %89 = vector.shape_cast %88 : vector<1x256x16xbf16> to vector<256x16xbf16>
    %cst_54 = arith.constant dense<0.000000e+00> : vector<32x16xf32>
    %90 = tpu.matmul %87, %89, %cst_54 {dimension_numbers = #tpu.dot_dimension_numbers<[1], [0], [0], [1], [0, 0, 1, 1], [], []>} : vector<32x256xbf16>, vector<256x16xbf16>, vector<32x16xf32> -> vector<32x16xf32>
    %c0_55 = arith.constant 0 : index
    %c0_56 = arith.constant 0 : index
    %91 = vector.load %arg15[%c0_55, %c0_56] : memref<32x1xf32, #tpu.memory_space<vmem>>, vector<32x1xf32>
    %92 = vector.broadcast %91 : vector<32x1xf32> to vector<32x16xf32>
    %93 = arith.addf %90, %92 : vector<32x16xf32>
    %c0_57 = arith.constant 0 : index
    %c0_58 = arith.constant 0 : index
    %c0_59 = arith.constant 0 : index
    %c0_60 = arith.constant 0 : index
    %94 = vector.load %arg17[%c0_57, %c0_58, %c0_59, %c0_60] : memref<1x1x32x16xf32, #tpu.memory_space<vmem>>, vector<1x1x32x16xf32>
    %95 = vector.shape_cast %94 : vector<1x1x32x16xf32> to vector<32x16xf32>
    %96 = vector.shape_cast %93 : vector<32x16xf32> to vector<1x1x32x16xf32>
    tpu.vector_store %arg17[%c0_57, %c0_58, %c0_59, %c0_60], %96 {strides = array<i32>} : memref<1x1x32x16xf32, #tpu.memory_space<vmem>>, vector<1x1x32x16xf32>,
    return
  }
  func.func @transform_0(%arg0: i32, %arg1: i32) -> (i32, i32, i32) {
    %c0_i32 = arith.constant 0 : i32
    %c0_i32_0 = arith.constant 0 : i32
    %c0_i32_1 = arith.constant 0 : i32
    return %arg0, %c0_i32, %c0_i32_0 : i32, i32, i32
  }
  func.func @transform_1(%arg0: i32, %arg1: i32) -> (i32, i32, i32, i32) {
    %c0_i32 = arith.constant 0 : i32
    %c0_i32_0 = arith.constant 0 : i32
    %c0_i32_1 = arith.constant 0 : i32
    return %arg0, %arg1, %c0_i32, %c0_i32_0 : i32, i32, i32, i32
  }
  func.func @transform_2(%arg0: i32, %arg1: i32) -> (i32, i32, i32, i32) {
    %c0_i32 = arith.constant 0 : i32
    %c0_i32_0 = arith.constant 0 : i32
    %c0_i32_1 = arith.constant 0 : i32
    return %arg0, %arg1, %c0_i32, %c0_i32_0 : i32, i32, i32, i32
  }
  func.func @transform_3(%arg0: i32, %arg1: i32) -> (i32, i32, i32, i32) {
    %c0_i32 = arith.constant 0 : i32
    %c0_i32_0 = arith.constant 0 : i32
    %c0_i32_1 = arith.constant 0 : i32
    return %arg0, %arg1, %c0_i32, %c0_i32_0 : i32, i32, i32, i32
  }
  func.func @transform_4(%arg0: i32, %arg1: i32) -> (i32, i32, i32) {
    %c0_i32 = arith.constant 0 : i32
    %c0_i32_0 = arith.constant 0 : i32
    %c0_i32_1 = arith.constant 0 : i32
    return %arg0, %c0_i32, %c0_i32_0 : i32, i32, i32
  }
  func.func @transform_5(%arg0: i32, %arg1: i32) -> (i32, i32, i32) {
    %c0_i32 = arith.constant 0 : i32
    %c0_i32_0 = arith.constant 0 : i32
    %c0_i32_1 = arith.constant 0 : i32
    return %arg0, %c0_i32, %c0_i32_0 : i32, i32, i32
  }
  func.func @transform_6(%arg0: i32, %arg1: i32) -> (i32, i32) {
    %c0_i32 = arith.constant 0 : i32
    %c0_i32_0 = arith.constant 0 : i32
    %c0_i32_1 = arith.constant 0 : i32
    return %c0_i32, %c0_i32_0 : i32, i32
  }
  func.func @transform_7(%arg0: i32, %arg1: i32) -> (i32, i32) {
    %c0_i32 = arith.constant 0 : i32
    %c0_i32_0 = arith.constant 0 : i32
    %c0_i32_1 = arith.constant 0 : i32
    return %c0_i32, %c0_i32_0 : i32, i32
  }
  func.func @transform_8(%arg0: i32, %arg1: i32) -> (i32, i32) {
    %c0_i32 = arith.constant 0 : i32
    %c0_i32_0 = arith.constant 0 : i32
    %c0_i32_1 = arith.constant 0 : i32
    return %c0_i32, %c0_i32_0 : i32, i32
  }
  func.func @transform_9(%arg0: i32, %arg1: i32) -> (i32, i32) {
    %c0_i32 = arith.constant 0 : i32
    %c0_i32_0 = arith.constant 0 : i32
    %c0_i32_1 = arith.constant 0 : i32
    return %c0_i32, %c0_i32_0 : i32, i32
  }
  func.func @transform_10(%arg0: i32, %arg1: i32) -> (i32, i32) {
    %c0_i32 = arith.constant 0 : i32
    %c0_i32_0 = arith.constant 0 : i32
    %c0_i32_1 = arith.constant 0 : i32
    return %c0_i32, %c0_i32_0 : i32, i32
  }
  func.func @transform_11(%arg0: i32, %arg1: i32) -> (i32, i32) {
    %c0_i32 = arith.constant 0 : i32
    %c0_i32_0 = arith.constant 0 : i32
    %c0_i32_1 = arith.constant 0 : i32
    return %c0_i32, %c0_i32_0 : i32, i32
  }
  func.func @transform_12(%arg0: i32, %arg1: i32) -> (i32, i32) {
    %c0_i32 = arith.constant 0 : i32
    %c0_i32_0 = arith.constant 0 : i32
    %c0_i32_1 = arith.constant 0 : i32
    return %c0_i32, %c0_i32_0 : i32, i32
  }
  func.func @transform_13(%arg0: i32, %arg1: i32) -> (i32, i32) {
    %c0_i32 = arith.constant 0 : i32
    %c0_i32_0 = arith.constant 0 : i32
    %c0_i32_1 = arith.constant 0 : i32
    return %c0_i32, %c0_i32_0 : i32, i32
  }
  func.func @transform_14(%arg0: i32, %arg1: i32) -> (i32, i32, i32, i32, i32) {
    %c0_i32 = arith.constant 0 : i32
    %c0_i32_0 = arith.constant 0 : i32
    %c0_i32_1 = arith.constant 0 : i32
    %c0_i32_2 = arith.constant 0 : i32
    return %arg0, %c0_i32, %arg1, %c0_i32_0, %c0_i32_1 : i32, i32, i32, i32, i32
  }
  func.func @transform_15(%arg0: i32, %arg1: i32) -> (i32, i32, i32, i32) {
    %c0_i32 = arith.constant 0 : i32
    %c0_i32_0 = arith.constant 0 : i32
    %c0_i32_1 = arith.constant 0 : i32
    return %arg0, %arg1, %c0_i32, %c0_i32_0 : i32, i32, i32, i32
  }
  func.func @transform_16(%arg0: i32, %arg1: i32) -> (i32, i32, i32, i32) {
    %c0_i32 = arith.constant 0 : i32
    %c0_i32_0 = arith.constant 0 : i32
    %c0_i32_1 = arith.constant 0 : i32
    return %arg0, %arg1, %c0_i32, %c0_i32_0 : i32, i32, i32, i32
  }
}

</mosaic_0001>

<bundles_post_ra>
// kernel: tpu_custom_call.1
= control target key start
LH: loop header
LB: loop body
LE: loop exit
PB: predicated region body
PF: predicated region fallthrough
CT: control target
= control target key end

     0   :  { %s3581_s0 = inlined_call_operand.vmem [shape: f32[2,3,256], index: 0, kind: input, shape index: {}]   ;;  %s3582_s1 = inlined_call_operand.vmem [shape: f32[2,1,3,16], index: 1, kind: input, shape index: {}]   ;;  %s3583_s2 = inlined_call_operand.vmem [shape: f32[2,1,1,256], index: 2, kind: input, shape index: {}]   ;;  %s3584_s3 = inlined_call_operand.vmem [shape: f32[2,1,1,256], index: 3, kind: input, shape index: {}]   ;;  %s3585_s4 = inlined_call_operand.vmem [shape: f32[2,1,256], index: 4, kind: input, shape index: {}]   ;;  %s3586_s5 = inlined_call_operand.vmem [shape: bf16[2,256,16], index: 5, kind: input, shape index: {}]   ;;  %s3587_s6 = inlined_call_operand.vmem [shape: f32[128,1], index: 6, kind: input, shape index: {}]   ;;  %s3588_s7 = inlined_call_operand.vmem [shape: f32[128,1], index: 7, kind: input, shape index: {}]   ;;  %s3589_s8 = inlined_call_operand.vmem [shape: bf16[128,128], index: 8, kind: input, shape index: {}]   ;;  %s3590_s9 = inlined_call_operand.vmem [shape: f32[128,1], index: 9, kind: input, shape index: {}]   ;;  %s3591_s10 = inlined_call_operand.vmem [shape: bf16[8,128], index: 10, kind: input, shape index: {}]   ;;  %s3592_s11 = inlined_call_operand.vmem [shape: f32[8,1], index: 11, kind: input, shape index: {}]   ;;  %s3593_s12 = inlined_call_operand.vmem [shape: bf16[32,128], index: 12, kind: input, shape index: {}]   ;;  %s3594_s13 = inlined_call_operand.vmem [shape: f32[32,1], index: 13, kind: input, shape index: {}]   ;;  %s3595_s14 = inlined_call_operand.hbm [shape: f32[2,8,1,1,256], index: 14, kind: output, shape index: {0}]   ;;  %s3596_s15 = inlined_call_operand.vmem [shape: f32[2,1,32,16], index: 15, kind: output, shape index: {1}]   ;;  %s3597_s16 = inlined_call_operand.vmem [shape: f32[2,1,3,256], index: 16, kind: output, shape index: {2}]  }
   0x1   :  { %3603 = sst [smem:[#allocation11_spill]] %s3581_s0 }
   0x2   :  { %3604 = sst [smem:[#allocation12_spill]] %s3582_s1 }
   0x3   :  { %3605 = sst [smem:[#allocation13_spill]] %s3596_s15 }
   0x4   :  { %22 = vsyncpa [#allocation3], 0 }
   0x5   :  { %24 = vsyncpa [#allocation3 + $0x1], 0  ;;  %s2808_s21 = smov 0   ;;  %s2810_s22 = smov 0  }
   0x6   :  { %s2812_s23 = smov 0   ;;  %s2814_s24 = smov 0  }
   0x7   :  { %s2816_s25 = smov 0   ;;  %s2818_s26 = smov 0  }
   0x8 LB: > { %3606 = sst [smem:[#allocation5_spill]] %s2694_s21  ;;  %s2366_s27 = sadd.s32 4294967295, %s2714_s26   ;;  %s2714_s26 = sphi %s2818_s26, %s30_s26   ;;  %s2710_s25 = sphi %s2816_s25, %s3626_s25   ;;  %s2706_s24 = sphi %s2814_s24, %s3625_s24   ;;  %s2702_s23 = sphi %s2812_s23, %s3624_s23   ;;  %s2698_s22 = sphi %s2810_s22, %s3628_s22   ;;  %s2694_s21 = sphi %s2808_s21, %s3627_s21  }
   0x9   : > { %3607 = sst [smem:[#allocation6_spill]] %s2702_s23  ;;  %s2367_s28 = sadd.s32 4294967294, %s2714_s26  }
   0xa   : > { %3608 = sst [smem:[#allocation7_spill]] %s2710_s25  ;;  %s42_s29 = sadd.s32 1, %s2710_s25 }
   0xb   : > { %s381_s30 = sadd.s32 1, %s2702_s23  ;;  %p44_p0 = scmp.ge.s32.totalorder %s42_s29, 2 }
   0xc   : > { %p391_p1 = scmp.ne.s32.totalorder %s2702_s23, %s2698_s22  ;;  %p392_p2 = scmp.eq.s32.totalorder %s2366_s27, 1 }
   0xd   : > { %p397_p3 = scmp.ne.s32.totalorder %s2698_s22, %s2694_s21  ;;  %s3630_s29 = smov (%p44_p0, %s42_s29), 0 }
   0xe   : > { %3609 = sst [smem:[#allocation8_spill]] %s3630_s29  ;;  %p2848_p4 = por %p392_p2, %p391_p1 }
   0xf   : > { %p398_p5 = scmp.eq.s32.totalorder %s2367_s28, 1  ;;  %s376_s17 = ssub.s32 %s2710_s25, %s3630_s29 }
  0x10   : > { %p2370_p6 = scmp.ge.s32.totalorder %s2714_s26, 1  ;;  %p379_p7 = scmp.eq.s32.totalorder %s376_s17, 0 }
  0x11   : > { %p2855_p8 = por %p398_p5, %p397_p3  ;;  %p551_p9 = scmp.lt.s32.totalorder %s2714_s26, 3 }
  0x12   : > { %s2861_s19 = scalar_select %p379_p7, %s2702_s23, %s381_s30  }
  0x13   : > { %s3611_s18 = scalar_select %p2855_p8, 1, 0 }
  0x14   : > { %3613 = sst [smem:[#allocation10_spill]] %s2861_s19  ;;  %p552_p10 = pnand %p2370_p6, %p551_p9 }
  0x15   : > { %3612 = sst [smem:[#allocation9_spill]] %s3611_s18  ;;  %v887_v0 = vld [vmem:[%s3587_s6] sm:$0xff] (!%p552_p10)  ;;  %v889_v1 = vld [vmem:[%s3587_s6 + $0x10] sm:$0xff] (!%p552_p10)  ;;  %v711_v2 = vlaneseq (!%p552_p10)  ;;  %v2716_v3 = vmov (!%p552_p10), 0   ;;  %p651_p11 = scmp.lt.s32.totalorder (!%p552_p10), %s2706_s24, 1  ;;  %v888_v6 = vld [vmem:[%s3587_s6 + $0x8] sm:$0xff] (!%p552_p10) }
  0x16   : > { %555 = sbr.rel (%p552_p10) target bundleno = 1131 (0x46b), region = 76  ;;  %2540 = vset.pattern.permute.xlu0 (!%p552_p10), %v2716_v3  ;;  %2541 = vset.pattern.permute.xlu1 (!%p552_p10), %v2716_v3  ;;  %v890_v7 = vld [vmem:[%s3587_s6 + $0x18] sm:$0xff] (!%p552_p10)  ;;  %v2717_v8 = vmov (!%p552_p10), 0.0   ;;  %v1058_v14 = vld [vmem:[%s3588_s7] sm:$0xff] (!%p552_p10)  ;;  %v1059_v15 = vld [vmem:[%s3588_s7 + $0x8] sm:$0xff] (!%p552_p10)  ;;  %s3616_s1 = sld [smem:[#allocation12_spill]] (!%p552_p10) }
  0x17   : > { %916 = vperm.xlu0 (!%p552_p10), %2540, %v887_v0   ;;  %926 = vperm.xlu1 (!%p552_p10), %2541, %v889_v1   ;;  %v2873_v4 = vshrl.u32 (!%p552_p10), %v711_v2, 7  ;;  %v715_v5 = vand.u32 (!%p552_p10), 127, %v711_v2  ;;  %v891_v18 = vld [vmem:[%s3587_s6 + $0x20] sm:$0xff] (!%p552_p10)  ;;  %v892_v19 = vld [vmem:[%s3587_s6 + $0x28] sm:$0xff] (!%p552_p10)  ;;  %v2718_v20 = vmov (!%p552_p10), 1.0|1.0  }
  0x18   : > { %810 = vmatprep.mubr.f32.mxu0 (!%p552_p10), %v2717_v8  ;;  %1442 = vmatprep.mubr.bf16.mxu1 (!%p552_p10), %v2716_v3  ;;  %vm742_vm14 = vcmask (!%p552_p10), 130048   ;;  %v1060_v22 = vld [vmem:[%s3588_s7 + $0x10] sm:$0xff] (!%p552_p10)  ;;  %v1061_v23 = vld [vmem:[%s3588_s7 + $0x18] sm:$0xff] (!%p552_p10)  ;;  %v1062_v26 = vld [vmem:[%s3588_s7 + $0x20] sm:$0xff] (!%p552_p10)  ;;  %s3617_s21 = sld [smem:[#allocation11_spill]] (!%p552_p10) }
  0x19   : > { %v713_v9 = vadd.s32 (!%p552_p10), 8, %v2873_v4  ;;  %v716_v10 = vadd.s32 (!%p552_p10), 128, %v715_v5  ;;  %v717_v11 = vmul.u32 (!%p552_p10), 16, %v2873_v4  ;;  %v893_v24 = vld [vmem:[%s3587_s6 + $0x30] sm:$0xff] (!%p552_p10)  ;;  %v894_v25 = vld [vmem:[%s3587_s6 + $0x38] sm:$0xff] (!%p552_p10)  ;;  %v1063_v27 = vld [vmem:[%s3588_s7 + $0x28] sm:$0xff] (!%p552_p10) }
  0x1a   : > { %v895_v28 = vld [vmem:[%s3587_s6 + $0x40] sm:$0xff] (!%p552_p10)  ;;  %v896_v29 = vld [vmem:[%s3587_s6 + $0x48] sm:$0xff] (!%p552_p10)  ;;  %v1064_v30 = vld [vmem:[%s3588_s7 + $0x30] sm:$0xff] (!%p552_p10) }
  0x1b   : > { %921 = vperm.xlu0 (!%p552_p10), %2540, %v888_v6   ;;  %v718_v12 = vmul.u32 (!%p552_p10), 16, %v713_v9  ;;  %vm720_vm0 = vcmp.ge.s32.totalorder (!%p552_p10), %v716_v10, %v717_v11  ;;  %v723_v13 = vadd.s32 (!%p552_p10), 16, %v717_v11  ;;  %931 = vperm.xlu1 (!%p552_p10), %2541, %v890_v7   ;;  %vm719_vm1 = vcmp.ge.s32.totalorder (!%p552_p10), %v715_v5, %v717_v11  ;;  %v1065_v31 = vld [vmem:[%s3588_s7 + $0x38] sm:$0xff] (!%p552_p10)  ;;  %v897_v32 = vld [vmem:[%s3587_s6 + $0x50] sm:$0xff] (!%p552_p10)  ;;  %v1066_v34 = vld [vmem:[%s3588_s7 + $0x40] sm:$0xff] (!%p552_p10) }
  0x1c   : > { %v898_v33 = vld [vmem:[%s3587_s6 + $0x58] sm:$0xff] (!%p552_p10)  ;;  %v1067_v35 = vld [vmem:[%s3588_s7 + $0x48] sm:$0xff] (!%p552_p10)  ;;  %v899_v36 = vld [vmem:[%s3587_s6 + $0x60] sm:$0xff] (!%p552_p10) }
  0x1d   : > { %s2886_s17 = scalar_select %p651_p11, %s2706_s24, 1  ;;  %vm722_vm2 = vcmp.ge.s32.totalorder %v716_v10, %v718_v12  ;;  %v724_v16 = vadd.s32 16, %v718_v12  ;;  %vm726_vm3 = vcmp.lt.s32.totalorder %v716_v10, %v723_v13  ;;  %vm725_vm5 = vcmp.lt.s32.totalorder %v715_v5, %v723_v13  ;;  %v900_v37 = vld [vmem:[%s3587_s6 + $0x68] sm:$0xff]  ;;  %v1068_v38 = vld [vmem:[%s3588_s7 + $0x50] sm:$0xff]  ;;  %v1069_v39 = vld [vmem:[%s3588_s7 + $0x58] sm:$0xff] }
  0x1e   : > { %vm2894_vm4 = vmand %vm720_vm0, %vm726_vm3  ;;  %vm721_vm7 = vcmp.ge.s32.totalorder %v715_v5, %v718_v12  ;;  %v901_v40 = vld [vmem:[%s3587_s6 + $0x70] sm:$0xff]  ;;  %v902_v41 = vld [vmem:[%s3587_s6 + $0x78] sm:$0xff] }
  0x1f   : > { %s2374_s15 = sshll.u32 %s2886_s17, 2  ;;  %vm728_vm6 = vcmp.lt.s32.totalorder %v716_v10, %v724_v16  ;;  %vm727_vm8 = vcmp.lt.s32.totalorder %v715_v5, %v724_v16  ;;  %vm729_vm9 = vmand %vm719_vm1, %vm725_vm5  ;;  %1076 = vperm.xlu0 %2540, %v1058_v14   ;;  %1081 = vperm.xlu1 %2541, %v1059_v15   ;;  %v1070_v42 = vld [vmem:[%s3588_s7 + $0x60] sm:$0xff]  ;;  %v1071_v43 = vld [vmem:[%s3588_s7 + $0x68] sm:$0xff]  ;;  %s3090_s27 = sshll.u32 %s2886_s17, 1 }
  0x20   : > { %vm732_vm10 = vmand %vm722_vm2, %vm728_vm6  ;;  %s662_s25 = scalar_lea.vmem %s3616_s1, %s2374_s15  ;;  %v1072_v44 = vld [vmem:[%s3588_s7 + $0x70] sm:$0xff]  ;;  %v1073_v45 = vld [vmem:[%s3588_s7 + $0x78] sm:$0xff]  ;;  %s2426_s15 = sshll.u32 %s2886_s17, 3 }
  0x21   : > { %vm2459_vm11 = vmpackc.low %vm732_vm10, %vm2894_vm4  ;;  %v741_v21 = vld [vmem:[%s662_s25] sm:$0x7]  ;;  %s2427_s25 = sshll.u32 %s2886_s17, 7  ;;  %v1267_v47 = vld [vmem:[%s3590_s9 + $0x8] sm:$0xff]  ;;  %s655_s20 = scalar_lea.vmem %s3617_s21, %s2426_s15  ;;  %vm3482_vm4 = vcmp.lt.s32.totalorder %v711_v2, 256 }
  0x22   : > { %2460 = vmatprep.subr.msk.bf16.mxu0 %vm2459_vm11, %v2718_v20  ;;  %vm731_vm12 = vmand %vm721_vm7, %vm727_vm8  ;;  %s2937_s18 = scalar_lea.vmem %s3586_s5, %s2427_s25  ;;  %v1266_v46 = vld [vmem:[%s3590_s9] sm:$0xff]  ;;  %v1268_v48 = vld [vmem:[%s3590_s9 + $0x10] sm:$0xff]  ;;  %s670_s23 = scalar_lea.vmem %s3583_s2, %s3090_s27 }
  0x23   : > { %vm2461_vm13 = vmpackc.low %vm731_vm12, %vm729_vm9  ;;  %936 = vperm.xlu0 %2540, %v891_v18   ;;  %941 = vperm.xlu1 %2541, %v892_v19   ;;  %v1269_v49 = vld [vmem:[%s3590_s9 + $0x18] sm:$0xff]  ;;  %v1270_v50 = vld [vmem:[%s3590_s9 + $0x20] sm:$0xff]  ;;  %s678_s1 = scalar_lea.vmem %s3584_s3, %s3090_s27  ;;  %s682_s25 = scalar_lea.vmem %s3585_s4, %s3090_s27 }
  0x24   : > { %2462 = vmatpush1.bf16.msk.msra.mxu0 %vm2461_vm13, %v2718_v20  ;;  %v1271_v51 = vld [vmem:[%s3590_s9 + $0x28] sm:$0xff]  ;;  %v1272_v52 = vld [vmem:[%s3590_s9 + $0x30] sm:$0xff]  ;;  %v1273_v53 = vld [vmem:[%s3590_s9 + $0x38] sm:$0xff] }
  0x25   : > { %v1274_v54 = vld [vmem:[%s3590_s9 + $0x40] sm:$0xff]  ;;  %v1275_v55 = vld [vmem:[%s3590_s9 + $0x48] sm:$0xff]  ;;  %v1276_v56 = vld [vmem:[%s3590_s9 + $0x50] sm:$0xff] }
  0x26   : > { %v1277_v57 = vld [vmem:[%s3590_s9 + $0x58] sm:$0xff]  ;;  %v1278_v58 = vld [vmem:[%s3590_s9 + $0x60] sm:$0xff]  ;;  %v1279_v59 = vld [vmem:[%s3590_s9 + $0x68] sm:$0xff] }
  0x27   : > { %2392 = vmatmul.mubr.msk.f32.vlgmr.msra.gmra.mrb[0].mxu0 %vm742_vm14, %v741_v21  ;;  %1086 = vperm.xlu0 %2540, %v1060_v22   ;;  %v1280_v60 = vld [vmem:[%s3590_s9 + $0x70] sm:$0xff]  ;;  %v1281_v61 = vld [vmem:[%s3590_s9 + $0x78] sm:$0xff]  ;;  %v1684_v62 = vld [vmem:[%s3592_s11] sm:$0xff] }
  0x28   : > { %1091 = vperm.xlu1 %2541, %v1061_v23   ;;  %1722 = vmatprep.mubr.bf16.mxu0 %v2716_v3  ;;  %v1923_v63 = vld [vmem:[%s3594_s13] sm:$0xff]  ;;  %v1924_v0 = vld [vmem:[%s3594_s13 + $0x8] sm:$0xff]  ;;  %v1925_v1 = vld [vmem:[%s3594_s13 + $0x10] sm:$0xff] }
  0x29   : > { %v1926_v5 = vld [vmem:[%s3594_s13 + $0x18] sm:$0xff]  ;;  %v817_v16 = vld [vmem:[%s655_s20] sm:$0x77]  ;;  %s705_s20 = scalar_lea.vmem %s3597_s16, %s2426_s15 }
  0x2b   : > { %946 = vperm.xlu0 %2540, %v893_v24  }
  0x2c   : > { %951 = vperm.xlu1 %2541, %v894_v25  }
  0x2f   : > { %1096 = vperm.xlu0 %2540, %v1062_v26  }
  0x30   : > { %1101 = vperm.xlu1 %2541, %v1063_v27  }
  0x33   : > { %956 = vperm.xlu0 %2540, %v895_v28   ;;  %v2719_v28 = vmov 1966171168  }
  0x34   : > { %961 = vperm.xlu1 %2541, %v896_v29   ;;  %v870_v29 = vunpack.c.l.s4 %v2719_v28 }
  0x37   : > { %1106 = vperm.xlu0 %2540, %v1064_v30  }
  0x38   : > { %1111 = vperm.xlu1 %2541, %v1065_v31  }
  0x3b   : > { %966 = vperm.xlu0 %2540, %v897_v32   ;;  %v871_v32 = vunpack.c.0.s8 %v870_v29 }
  0x3c   : > { %971 = vperm.xlu1 %2541, %v898_v33  }
  0x3f   : > { %1116 = vperm.xlu0 %2540, %v1066_v34  }
  0x40   : > { %1121 = vperm.xlu1 %2541, %v1067_v35  }
  0x43   : > { %976 = vperm.xlu0 %2540, %v899_v36   ;;  %v3095_v36 = vsub.s32 %v871_v32, %v2873_v4 }
  0x44   : > { %981 = vperm.xlu1 %2541, %v900_v37  }
  0x47   : > { %1126 = vperm.xlu0 %2540, %v1068_v38  }
  0x48   : > { %1131 = vperm.xlu1 %2541, %v1069_v39  }
  0x4b   : > { %986 = vperm.xlu0 %2540, %v901_v40  }
  0x4c   : > { %991 = vperm.xlu1 %2541, %v902_v41  }
  0x4f   : > { %1136 = vperm.xlu0 %2540, %v1070_v42  }
  0x50   : > { %1141 = vperm.xlu1 %2541, %v1071_v43  }
  0x53   : > { %1146 = vperm.xlu0 %2540, %v1072_v44  }
  0x54   : > { %1151 = vperm.xlu1 %2541, %v1073_v45   ;;  %v867_v45 = vld [vmem:[%s670_s23] sm:$0x3] }
  0x57   : > { %1284 = vperm.xlu0 %2540, %v1266_v46  }
  0x58   : > { %1289 = vperm.xlu1 %2541, %v1267_v47   ;;  %v885_v47 = vld [vmem:[%s678_s1] sm:$0x3]  ;;  %s2430_s1 = sshll.u32 %s2706_s24, 8  ;;  %s2720_s24 = smov [#allocation2]  }
  0x59   : > { %s3521_s15 = scalar_lea.hbm %s3595_s14, %s2430_s1  ;;  %s2640_s23 = sshll.u32 %s2720_s24, 4  ;;  %s2641_s23 = int_to_ptr.vmem [resolvable:$false] %s2640_s23 }
  0x5b   : > { %1294 = vperm.xlu0 %2540, %v1268_v48   ;;  %v3112_v48 = vsub.s32 0, %v2873_v4 }
  0x5c   : > { %1299 = vperm.xlu1 %2541, %v1269_v49  }
  0x5f   : > { %1304 = vperm.xlu0 %2540, %v1270_v50   ;;  %v910_v50 = vsub.s32 1, %v2873_v4 }
  0x60   : > { %1309 = vperm.xlu1 %2541, %v1271_v51  }
  0x63   : > { %1314 = vperm.xlu0 %2540, %v1272_v52  }
  0x64   : > { %1319 = vperm.xlu1 %2541, %v1273_v53  }
  0x67   : > { %1324 = vperm.xlu0 %2540, %v1274_v54  }
  0x68   : > { %1329 = vperm.xlu1 %2541, %v1275_v55  }
  0x6b   : > { %1334 = vperm.xlu0 %2540, %v1276_v56   ;;  %v849_v56 = vsub.s32 4, %v2873_v4 }
  0x6c   : > { %1339 = vperm.xlu1 %2541, %v1277_v57  }
  0x6f   : > { %1344 = vperm.xlu0 %2540, %v1278_v58  }
  0x70   : > { %1349 = vperm.xlu1 %2541, %v1279_v59  }
  0x73   : > { %1354 = vperm.xlu0 %2540, %v1280_v60  }
  0x74   : > { %1359 = vperm.xlu1 %2541, %v1281_v61  }
  0x77   : > { %1687 = vperm.xlu0 %2540, %v1684_v62  }
  0x78   : > { %1929 = vperm.xlu1 %2541, %v1923_v63  }
  0x7b   : > { %1934 = vperm.xlu0 %2540, %v1924_v0  }
  0x7c   : > { %1939 = vperm.xlu1 %2541, %v1925_v1  }
  0x7f   : > { %1944 = vperm.xlu0 %2540, %v1926_v5  }
  0x96   : > { %v917_v6 = vpop.permute.xlu0 %916  ;;  %v3053_v7 = vpop.permute.xlu1 %926 }
  0x9a   : > { %v922_v8 = vpop.permute.xlu0 %921  ;;  %v3055_v9 = vpop.permute.xlu1 %931 }
  0x9e   : > { %v3057_v10 = vpop.permute.xlu0 %1076  ;;  %v3059_v11 = vpop.permute.xlu1 %1081 }
  0xa2   : > { %v3067_v12 = vpop.permute.xlu0 %936  ;;  %v3069_v13 = vpop.permute.xlu1 %941 }
  0xa6   : > { %v3073_v19 = vpop.permute.xlu0 %1086 }
  0xa7   : > { %v3075_v20 = vpop.permute.xlu1 %1091 }
  0xaa   : > { %v3079_v25 = vpop.permute.xlu0 %946 }
  0xab   : > { %v3081_v26 = vpop.permute.xlu1 %951 }
  0xae   : > { %v3083_v30 = vpop.permute.xlu0 %1096 }
  0xaf   : > { %v3085_v31 = vpop.permute.xlu1 %1101 }
  0xb2   : > { %v3087_v33 = vpop.permute.xlu0 %956 }
  0xb3   : > { %v3092_v35 = vpop.permute.xlu1 %961 }
  0xb6   : > { %v3101_v41 = vpop.permute.xlu0 %1106 }
  0xb7   : > { %v3108_v44 = vpop.permute.xlu1 %1111 }
  0xba   : > { %v3115_v51 = vpop.permute.xlu0 %966 }
  0xbb   : > { %v3117_v53 = vpop.permute.xlu1 %971 }
  0xbe   : > { %v3139_v5 = vpop.permute.xlu0 %1116 }
  0xfa   : > { %v812_v14 = vpop.f32.mrb[0].mxu0 }
  0xfb   : > { %v814_v15 = vpop.f32.mrb[1].mxu0 }
  0xfc   : > { %v820_v17 = vcombine.low %v812_v14, %v814_v15 }
  0xfe   : > { %v3071_v18 = vsub.f32 %v817_v16, %v820_v17 }
 0x100   : > { %v823_v21 = vmul.f32 %v3071_v18, %v3071_v18 }
 0x102   : > { %v2393_v22 = vrot.slane %v823_v21, 9  ;;  %v2394_v24 = vrot.slane %v823_v21, 10 }
 0x104   : > { %v828_v23 = vadd.f32 %v2393_v22, %v823_v21 }
 0x106   : > { %v832_v27 = vadd.f32 %v2394_v24, %v828_v23 }
 0x108   : > { %2568 = vrsqrt.f32 %v832_v27  ;;  %vm835_vm15 = vcmp.eq.f32.partialorder %v832_v27, inf  ;;  %v838_v38 = vand.u32 2147483648, %v832_v27  ;;  %vm837_vm0 = vcmp.eq.f32.partialorder %v832_v27, 0.0 }
 0x112   : > { %v2569_v34 = vpop.eup %2568 }
 0x113   : > { %v834_v37 = vmul.f32 %v2569_v34, %v832_v27 }
 0x115   : > { %v836_v39 = vsel %vm835_vm15, %v832_v27, %v834_v37 }
 0x116   : > { %v839_v40 = vsel %vm837_vm0, %v838_v38, %v836_v39 }
 0x117   : > { %v840_v42 = vadd.f32 1e-05, %v839_v40  ;;  %v875_v43 = vrot.slane %v839_v40, %v3095_v36 }
 0x119   : > { %2570 = vrcp.f32 %v840_v42  ;;  %v882_v46 = vrot.slane %v875_v43, %v3095_v36 }
 0x11b   : > { %v884_v49 = vmul.f32 %v882_v46, %v867_v45 }
 0x11d   : > { %v886_v52 = vadd.f32 %v885_v47, %v884_v49 }
 0x11f   : > { %v3120_v54 = vrot.slane %v886_v52, %v3112_v48  ;;  %v3124_v55 = vrot.slane %v886_v52, %v910_v50 }
 0x121   : > { %v995_v57 = vsub.f32 %v3124_v55, %v917_v6  ;;  %v997_v58 = vsub.f32 %v3124_v55, %v922_v8  ;;  %v994_v59 = vsub.f32 %v3120_v54, %v917_v6  ;;  %v996_v60 = vsub.f32 %v3120_v54, %v922_v8  ;;  %v3141_v8 = vpop.permute.xlu1 %1121 }
 0x122   : > { %v999_v61 = vsub.f32 %v3124_v55, %v3053_v7  ;;  %v1001_v62 = vsub.f32 %v3124_v55, %v3055_v9  ;;  %v998_v63 = vsub.f32 %v3120_v54, %v3053_v7  ;;  %v1000_v0 = vsub.f32 %v3120_v54, %v3055_v9 }
 0x123   : > { %v2571_v1 = vpop.eup %2570  ;;  %v1027_v14 = vmul.f32 %v995_v57, %v995_v57  ;;  %v1029_v15 = vmul.f32 %v997_v58, %v997_v58  ;;  %v1026_v6 = vmul.f32 %v994_v59, %v994_v59  ;;  %v1028_v16 = vmul.f32 %v996_v60, %v996_v60 }
 0x124   : > { %v846_v17 = vrot.slane %v2571_v1, %v3112_v48  ;;  %v850_v21 = vrot.slane %v2571_v1, %v849_v56  ;;  %v1031_v22 = vmul.f32 %v999_v61, %v999_v61  ;;  %v1033_v23 = vmul.f32 %v1001_v62, %v1001_v62 }
 0x125   : > { %v1155_v24 = vmul.f32 %v3057_v10, %v1027_v14  ;;  %v1157_v7 = vmul.f32 %v3059_v11, %v1029_v15  ;;  %v1154_v9 = vmul.f32 %v3057_v10, %v1026_v6  ;;  %v1156_v27 = vmul.f32 %v3059_v11, %v1028_v16  ;;  %v3156_v11 = vpop.permute.xlu0 %976  ;;  %v3165_v56 = vpop.permute.xlu1 %981 }
 0x126   : > { %v856_v28 = vrot.slane %v846_v17, %v3112_v48  ;;  %v860_v29 = vrot.slane %v850_v21, %v3112_v48  ;;  %v1159_v32 = vmul.f32 %v3073_v19, %v1031_v22  ;;  %v1161_v34 = vmul.f32 %v3075_v20, %v1033_v23 }
 0x127   : > { %v1187_v37 = vpack.c.bf16 %v1157_v7, %v1155_v24  ;;  %v1186_v38 = vpack.c.bf16 %v1156_v27, %v1154_v9  ;;  %v1030_v39 = vmul.f32 %v998_v63, %v998_v63  ;;  %v1032_v40 = vmul.f32 %v1000_v0, %v1000_v0 }
 0x128   : > { %v863_v42 = vcombine.low %v856_v28, %v860_v29  ;;  %v1189_v43 = vpack.c.bf16 %v1161_v34, %v1159_v32  ;;  %v1003_v45 = vsub.f32 %v3124_v55, %v3067_v12  ;;  %v1005_v10 = vsub.f32 %v3124_v55, %v3069_v13 }
 0x129   : > { %v1206_v46 = vmul.bf16 1069105081, %v1187_v37  ;;  %v1203_v47 = vmul.bf16 1069105081, %v1186_v38  ;;  %v1158_v49 = vmul.f32 %v3073_v19, %v1030_v39  ;;  %v1160_v52 = vmul.f32 %v3075_v20, %v1032_v40  ;;  %v1127_v16 = vpop.permute.xlu0 %1126  ;;  %v3184_v23 = vpop.permute.xlu1 %1131 }
 0x12a   : > { %v865_v57 = vmul.f32 %v863_v42, %v3071_v18  ;;  %v1212_v58 = vmul.bf16 1069105081, %v1189_v43  ;;  %v1035_v59 = vmul.f32 %v1003_v45, %v1003_v45  ;;  %v1037_v60 = vmul.f32 %v1005_v10, %v1005_v10 }
 0x12b   : > { %2572 = vpow.bf16 %v1206_v46  ;;  %v1188_v61 = vpack.c.bf16 %v1160_v52, %v1158_v49  ;;  %v1002_v62 = vsub.f32 %v3120_v54, %v3067_v12  ;;  %v1004_v63 = vsub.f32 %v3120_v54, %v3069_v13 }
 0x12c   : > { %866 = vst [vmem:[%s705_s20] sm:$0x77] %v865_v57  ;;  %2574 = vpow.bf16 %v1203_v47  ;;  %v1163_v19 = vmul.f32 %v3083_v30, %v1035_v59  ;;  %v1165_v20 = vmul.f32 %v3085_v31, %v1037_v60  ;;  %v1007_v18 = vsub.f32 %v3124_v55, %v3079_v25 }
 0x12d   : > { %2576 = vpow.bf16 %v1212_v58  ;;  %v1209_v0 = vmul.bf16 1069105081, %v1188_v61  ;;  %v1034_v1 = vmul.f32 %v1002_v62, %v1002_v62  ;;  %v1036_v14 = vmul.f32 %v1004_v63, %v1004_v63  ;;  %v987_v10 = vpop.permute.xlu0 %986 }
 0x12e   : > { %v1191_v15 = vpack.c.bf16 %v1165_v20, %v1163_v19  ;;  %v1009_v12 = vsub.f32 %v3124_v55, %v3081_v26  ;;  %v1039_v6 = vmul.f32 %v1007_v18, %v1007_v18  ;;  %v1006_v13 = vsub.f32 %v3120_v54, %v3079_v25 }
 0x12f   : > { %2578 = vpow.bf16 %v1209_v0  ;;  %v1162_v17 = vmul.f32 %v3083_v30, %v1034_v1  ;;  %v1164_v21 = vmul.f32 %v3085_v31, %v1036_v14  ;;  %v1008_v22 = vsub.f32 %v3120_v54, %v3081_v26 }
 0x130   : > { %v1218_v24 = vmul.bf16 1069105081, %v1191_v15  ;;  %v1041_v7 = vmul.f32 %v1009_v12, %v1009_v12  ;;  %v1167_v9 = vmul.f32 %v3101_v41, %v1039_v6  ;;  %v1038_v27 = vmul.f32 %v1006_v13, %v1006_v13 }
 0x131   : > { %v1190_v28 = vpack.c.bf16 %v1164_v21, %v1162_v17  ;;  %v1040_v29 = vmul.f32 %v1008_v22, %v1008_v22  ;;  %v1011_v25 = vsub.f32 %v3124_v55, %v3087_v33  ;;  %v1013_v30 = vsub.f32 %v3124_v55, %v3092_v35 }
 0x132   : > { %2580 = vpow.bf16 %v1218_v24  ;;  %v1169_v31 = vmul.f32 %v3108_v44, %v1041_v7  ;;  %v1166_v26 = vmul.f32 %v3101_v41, %v1038_v27  ;;  %v1010_v32 = vsub.f32 %v3120_v54, %v3087_v33 }
 0x133   : > { %v1215_v34 = vmul.bf16 1069105081, %v1190_v28  ;;  %v1168_v37 = vmul.f32 %v3108_v44, %v1040_v29  ;;  %v1043_v38 = vmul.f32 %v1011_v25, %v1011_v25  ;;  %v1045_v39 = vmul.f32 %v1013_v30, %v1013_v30  ;;  %v992_v44 = vpop.permute.xlu1 %991 }
 0x134   : > { %v1193_v40 = vpack.c.bf16 %v1169_v31, %v1167_v9  ;;  %v1012_v42 = vsub.f32 %v3120_v54, %v3092_v35  ;;  %v1042_v43 = vmul.f32 %v1010_v32, %v1010_v32  ;;  %v1015_v45 = vsub.f32 %v3124_v55, %v3115_v51 }
 0x135   : > { %2582 = vpow.bf16 %v1215_v34  ;;  %v1192_v46 = vpack.c.bf16 %v1168_v37, %v1166_v26  ;;  %v1171_v41 = vmul.f32 %v3139_v5, %v1043_v38  ;;  %v1173_v33 = vmul.f32 %v3141_v8, %v1045_v39 }
 0x136   : > { %v3202_v47 = vpop.eup %2572  ;;  %v1224_v49 = vmul.bf16 1069105081, %v1193_v40  ;;  %v1044_v52 = vmul.f32 %v1012_v42, %v1012_v42  ;;  %v1170_v57 = vmul.f32 %v3139_v5, %v1042_v43  ;;  %v1017_v35 = vsub.f32 %v3124_v55, %v3117_v53 }
 0x137   : > { %v3207_v58 = vpop.eup %2574  ;;  %1410 = vmatprep.subr.bf16.mxu1 %v3202_v47  ;;  %v1221_v59 = vmul.bf16 1069105081, %v1192_v46  ;;  %v1195_v60 = vpack.c.bf16 %v1173_v33, %v1171_v41  ;;  %v1047_v61 = vmul.f32 %v1015_v45, %v1015_v45  ;;  %v1014_v62 = vsub.f32 %v3120_v54, %v3115_v51  ;;  %v1142_v21 = vpop.permute.xlu1 %1141 }
 0x138   : > { %v3212_v63 = vpop.eup %2576  ;;  %1411 = vmatpush1.bf16.msra.mxu1 %v3207_v58  ;;  %2584 = vpow.bf16 %v1224_v49  ;;  %v1172_v5 = vmul.f32 %v3141_v8, %v1044_v52  ;;  %v1049_v19 = vmul.f32 %v1017_v35, %v1017_v35  ;;  %v1016_v20 = vsub.f32 %v3120_v54, %v3117_v53  ;;  %v1137_v8 = vpop.permute.xlu0 %1136 }
 0x139   : > { %1412 = vmatprep.subr.bf16.mxu1 %v3212_v63  ;;  %2586 = vpow.bf16 %v1221_v59  ;;  %v1230_v18 = vmul.bf16 1069105081, %v1195_v60  ;;  %v1175_v0 = vmul.f32 %v1127_v16, %v1047_v61  ;;  %v1046_v1 = vmul.f32 %v1014_v62, %v1014_v62 }
 0x13a   : > { %v3219_v14 = vpop.eup %2578  ;;  %v1194_v51 = vpack.c.bf16 %v1172_v5, %v1170_v57  ;;  %v1177_v15 = vmul.f32 %v3184_v23, %v1049_v19  ;;  %v1048_v12 = vmul.f32 %v1016_v20, %v1016_v20  ;;  %v1019_v6 = vsub.f32 %v3124_v55, %v3156_v11 }
 0x13b   : > { %2588 = vpow.bf16 %v1230_v18  ;;  %v1174_v13 = vmul.f32 %v1127_v16, %v1046_v1  ;;  %v1021_v53 = vsub.f32 %v3124_v55, %v3165_v56  ;;  %v1018_v17 = vsub.f32 %v3120_v54, %v3156_v11  ;;  %v1152_v41 = vpop.permute.xlu1 %1151 }
 0x13c   : > { %1413 = vmatpush1.bf16.msra.mxu1 %v3219_v14  ;;  %v1227_v22 = vmul.bf16 1069105081, %v1194_v51  ;;  %v1197_v24 = vpack.c.bf16 %v1177_v15, %v1175_v0  ;;  %v1176_v7 = vmul.f32 %v3184_v23, %v1048_v12  ;;  %v1051_v9 = vmul.f32 %v1019_v6, %v1019_v6  ;;  %v1147_v40 = vpop.permute.xlu0 %1146 }
 0x13d   : > { %v3230_v27 = vpop.eup %2580  ;;  %v1053_v28 = vmul.f32 %v1021_v53, %v1021_v53  ;;  %v1020_v16 = vsub.f32 %v3120_v54, %v3165_v56  ;;  %v1050_v29 = vmul.f32 %v1018_v17, %v1018_v17  ;;  %v1023_v25 = vsub.f32 %v3124_v55, %v987_v10  ;;  %v2544_v53 = vld [vmem:[%s3589_s8 + $0x10] sm:$0xff]   ;;  %v2545_v17 = vld [vmem:[%s3589_s8 + $0x18] sm:$0xff]  }
 0x13e   : > { %1414 = vmatprep.subr.bf16.mxu1 %v3230_v27  ;;  %2590 = vpow.bf16 %v1227_v22  ;;  %v1236_v11 = vmul.bf16 1069105081, %v1197_v24  ;;  %v1196_v30 = vpack.c.bf16 %v1176_v7, %v1174_v13  ;;  %v1179_v31 = vmul.f32 %v1137_v8, %v1051_v9  ;;  %v2543_v13 = vld [vmem:[%s3589_s8 + $0x8] sm:$0xff]   ;;  %v2548_v24 = vld [vmem:[%s3589_s8 + $0x30] sm:$0xff]   ;;  %v2549_v7 = vld [vmem:[%s3589_s8 + $0x38] sm:$0xff]  }
 0x13f   : > { %v1181_v26 = vmul.f32 %v1142_v21, %v1053_v28  ;;  %v1052_v32 = vmul.f32 %v1020_v16, %v1020_v16  ;;  %v1178_v34 = vmul.f32 %v1137_v8, %v1050_v29  ;;  %v1025_v23 = vsub.f32 %v3124_v55, %v992_v44  ;;  %v2542_v8 = vld [vmem:[%s3589_s8] sm:$0xff]   ;;  %v2547_v22 = vld [vmem:[%s3589_s8 + $0x28] sm:$0xff]   ;;  %v1290_v29 = vpop.permute.xlu1 %1289 }
 0x140   : > { %v3237_v37 = vpop.eup %2582  ;;  %2592 = vpow.bf16 %v1236_v11  ;;  %v1233_v38 = vmul.bf16 1069105081, %v1196_v30  ;;  %v1055_v39 = vmul.f32 %v1023_v25, %v1023_v25  ;;  %v1022_v56 = vsub.f32 %v3120_v54, %v987_v10  ;;  %v1285_v28 = vpop.permute.xlu0 %1284 }
 0x141   : > { %1415 = vmatpush1.bf16.msra.mxu1 %v3237_v37  ;;  %v1199_v42 = vpack.c.bf16 %v1181_v26, %v1179_v31  ;;  %v1180_v43 = vmul.f32 %v1142_v21, %v1052_v32  ;;  %v1057_v45 = vmul.f32 %v1025_v23, %v1025_v23  ;;  %v1024_v46 = vsub.f32 %v3120_v54, %v992_v44  ;;  %v2546_v21 = vld [vmem:[%s3589_s8 + $0x20] sm:$0xff]  }
 0x142   : > { %2594 = vpow.bf16 %v1233_v38  ;;  %v1183_v33 = vmul.f32 %v1147_v40, %v1055_v39  ;;  %v1054_v49 = vmul.f32 %v1022_v56, %v1022_v56 }
 0x143   : > { %v3242_v55 = vpop.eup %2584  ;;  %v1242_v52 = vmul.bf16 1069105081, %v1199_v42  ;;  %v1198_v57 = vpack.c.bf16 %v1180_v43, %v1178_v34  ;;  %v1185_v35 = vmul.f32 %v1152_v41, %v1057_v45  ;;  %v1056_v59 = vmul.f32 %v1024_v46, %v1024_v46  ;;  %v3316_v46 = vld [vmem:[%s2937_s18] sm:$0xff]  }
 0x144   : > { %v3244_v60 = vpop.eup %2586  ;;  %1416 = vmatprep.subr.bf16.mxu1 %v3242_v55  ;;  %v1182_v10 = vmul.f32 %v1147_v40, %v1054_v49  ;;  %v3312_v40 = vld [vmem:[%s2937_s18 + $0x40] sm:$0xff]   ;;  %v1295_v42 = vpop.permute.xlu0 %1294 }
 0x145   : > { %1417 = vmatpush1.bf16.msra.mxu1 %v3244_v60  ;;  %2596 = vpow.bf16 %v1242_v52  ;;  %v1239_v61 = vmul.bf16 1069105081, %v1198_v57  ;;  %v1201_v54 = vpack.c.bf16 %v1185_v35, %v1183_v33  ;;  %v1184_v44 = vmul.f32 %v1152_v41, %v1056_v59  ;;  %v1300_v41 = vpop.permute.xlu1 %1299  ;;  %v3321_v52 = vld [vmem:[%s2937_s18 + $0x48] sm:$0xff]  }
 0x146   : > { %v3248_v62 = vpop.eup %2588 }
 0x147   : > { %1418 = vmatprep.subr.bf16.mxu1 %v3248_v62  ;;  %2598 = vpow.bf16 %v1239_v61  ;;  %v1248_v5 = vmul.bf16 1069105081, %v1201_v54  ;;  %v1200_v19 = vpack.c.bf16 %v1184_v44, %v1182_v10 }
 0x149   : > { %v3251_v20 = vpop.eup %2590  ;;  %2600 = vpow.bf16 %v1248_v5  ;;  %v1245_v18 = vmul.bf16 1069105081, %v1200_v19 }
 0x14a   : > { %1419 = vmatpush1.bf16.msra.mxu1 %v3251_v20 }
 0x14b   : > { %v3254_v0 = vpop.eup %2592  ;;  %2602 = vpow.bf16 %v1245_v18  ;;  %v3329_v18 = vld [vmem:[%s2937_s18 + $0x8] sm:$0xff]  }
 0x14c   : > { %1420 = vmatprep.subr.bf16.mxu1 %v3254_v0 }
 0x14d   : > { %v3257_v1 = vpop.eup %2594 }
 0x14e   : > { %1421 = vmatpush1.bf16.msra.mxu1 %v3257_v1 }
 0x150   : > { %v3260_v51 = vpop.eup %2596 }
 0x151   : > { %1422 = vmatprep.subr.bf16.mxu1 %v3260_v51 }
 0x152   : > { %v3263_v15 = vpop.eup %2598 }
 0x153   : > { %1423 = vmatpush1.bf16.msra.mxu1 %v3263_v15 }
 0x154   : > { %v3266_v12 = vpop.eup %2600 }
 0x155   : > { %1424 = vmatprep.subr.bf16.mxu1 %v3266_v12 }
 0x156   : > { %v3269_v6 = vpop.eup %2602 }
 0x157   : > { %1425 = vmatpush1.bf16.msra.mxu1 %v3269_v6 }
 0x158   : > { %2463 = vmatprep.subr.bf16.mxu1 %v3312_v40 }
 0x15a   : > { %1443 = vmatmul.mubr.bf16.vlgmr.msra.gmra.mrb[0].mxu1 %v2542_v8 }
 0x15b   : > { %1452 = vmatprep.mubr.bf16.mxu1 %v2716_v3  ;;  %2471 = vmatpush3.bf16.msra.mxu1 %v3316_v46 }
 0x15c   : > { %2464 = vmatprep.subr.bf16.mxu1 %v3321_v52 }
 0x15f   : > { %2472 = vmatpush3.bf16.msra.mxu1 %v3329_v18 }
 0x162   : > { %1453 = vmatmul.mubr.bf16.gmra.mrb[4].mxu1 %v2543_v13 }
 0x163   : > { %1462 = vmatprep.mubr.bf16.mxu1 %v2716_v3 }
 0x16a   : > { %1463 = vmatmul.mubr.bf16.gmra.mrb[8].mxu1 %v2544_v53  ;;  %v3335_v53 = vld [vmem:[%s2937_s18 + $0x50] sm:$0xff]  }
 0x16b   : > { %1472 = vmatprep.mubr.bf16.mxu1 %v2716_v3  ;;  %2465 = vmatprep.subr.bf16.mxu1 %v3335_v53 }
 0x172   : > { %1473 = vmatmul.mubr.bf16.gmra.mrb[12].mxu1 %v2545_v17 }
 0x173   : > { %1482 = vmatprep.mubr.bf16.mxu1 %v2716_v3 }
 0x17a   : > { %1483 = vmatmul.mubr.bf16.gmra.mrb[16].mxu1 %v2546_v21 }
 0x17b   : > { %1492 = vmatprep.mubr.bf16.mxu1 %v2716_v3 }
 0x182   : > { %1493 = vmatmul.mubr.bf16.gmra.mrb[20].mxu1 %v2547_v22 }
 0x183   : > { %1502 = vmatprep.mubr.bf16.mxu1 %v2716_v3 }
 0x18a   : > { %1503 = vmatmul.mubr.bf16.gmra.mrb[24].mxu1 %v2548_v24 }
 0x18b   : > { %1512 = vmatprep.mubr.bf16.mxu1 %v2716_v3 }
 0x192   : > { %1513 = vmatmul.mubr.bf16.gmra.mrb[28].mxu1 %v2549_v7 }
 0x22d   : > { %v1444_v9 = vpop.f32.mrb[0].mxu1 }
 0x22e   : > { %v1446_v16 = vpop.f32.mrb[1].mxu1  ;;  %v1445_v11 = vadd.f32 %v1444_v9, %v1285_v28  ;;  %v1305_v9 = vpop.permute.xlu0 %1304 }
 0x22f   : > { %v1448_v25 = vpop.f32.mrb[2].mxu1  ;;  %v1447_v26 = vadd.f32 %v1446_v16, %v1285_v28 }
 0x230   : > { %v1449_v30 = vadd.f32 %v1448_v25, %v1290_v29  ;;  %v1450_v31 = vpop.f32.mrb[3].mxu1  ;;  %v1310_v25 = vpop.permute.xlu1 %1309 }
 0x231   : > { %v1451_v32 = vadd.f32 %v1450_v31, %v1290_v29  ;;  %v3345_v29 = vld [vmem:[%s2937_s18 + $0x10] sm:$0xff]  }
 0x232   : > { %v3303_v34 = vpack.c.bf16 %v1449_v30, %v1445_v11  ;;  %2473 = vmatpush3.bf16.msra.mxu1 %v3345_v29 }
 0x233   : > { %v3305_v23 = vpack.c.bf16 %v1451_v32, %v1447_v26 }
 0x234   : > { %v1539_v38 = vmul.bf16 %v3303_v34, %v3303_v34 }
 0x235   : > { %v1540_v39 = vmul.bf16 %v3305_v23, %v3305_v23  ;;  %v1454_v56 = vpop.f32.mrb[4].mxu1 }
 0x236   : > { %v1555_v43 = vmul.bf16 %v1539_v38, %v3303_v34  ;;  %v1456_v45 = vpop.f32.mrb[5].mxu1  ;;  %v1455_v35 = vadd.f32 %v1454_v56, %v1295_v42 }
 0x237   : > { %v1556_v33 = vmul.bf16 %v1540_v39, %v3305_v23  ;;  %v1458_v49 = vpop.f32.mrb[6].mxu1  ;;  %v1457_v54 = vadd.f32 %v1456_v45, %v1295_v42 }
 0x238   : > { %v1571_v57 = vmul.bf16 1027030327, %v1555_v43  ;;  %v1459_v59 = vadd.f32 %v1458_v49, %v1300_v41  ;;  %v1460_v10 = vpop.f32.mrb[7].mxu1 }
 0x239   : > { %v1572_v61 = vmul.bf16 1027030327, %v1556_v33  ;;  %v1461_v44 = vadd.f32 %v1460_v10, %v1300_v41 }
 0x23a   : > { %v1587_v5 = vadd.bf16 %v1571_v57, %v3303_v34  ;;  %v3326_v19 = vpack.c.bf16 %v1459_v59, %v1455_v35 }
 0x23b   : > { %v3331_v8 = vpack.c.bf16 %v1461_v44, %v1457_v54  ;;  %v1588_v13 = vadd.bf16 %v1572_v61, %v3305_v23  ;;  %v1315_v61 = vpop.permute.xlu0 %1314 }
 0x23c   : > { %v1603_v17 = vmul.bf16 1061961548, %v1587_v5  ;;  %v1541_v21 = vmul.bf16 %v3326_v19, %v3326_v19  ;;  %v1320_v5 = vpop.permute.xlu1 %1319 }
 0x23d   : > { %v1542_v22 = vmul.bf16 %v3331_v8, %v3331_v8  ;;  %v1464_v24 = vpop.f32.mrb[8].mxu1  ;;  %v1604_v7 = vmul.bf16 1061961548, %v1588_v13 }
 0x23e   : > { %2604 = vtanh.bf16 %v1603_v17  ;;  %v1557_v28 = vmul.bf16 %v1541_v21, %v3326_v19  ;;  %v1466_v16 = vpop.f32.mrb[9].mxu1  ;;  %v1465_v26 = vadd.f32 %v1464_v24, %v1305_v9 }
 0x23f   : > { %v1558_v11 = vmul.bf16 %v1542_v22, %v3331_v8  ;;  %v1468_v30 = vpop.f32.mrb[10].mxu1  ;;  %2606 = vtanh.bf16 %v1604_v7  ;;  %v1467_v56 = vadd.f32 %v1466_v16, %v1305_v9 }
 0x240   : > { %v1573_v31 = vmul.bf16 1027030327, %v1557_v28  ;;  %v1469_v32 = vadd.f32 %v1468_v30, %v1310_v25  ;;  %v1470_v38 = vpop.f32.mrb[11].mxu1 }
 0x241   : > { %v1574_v39 = vmul.bf16 1027030327, %v1558_v11  ;;  %v1471_v42 = vadd.f32 %v1470_v38, %v1310_v25 }
 0x242   : > { %v1589_v43 = vadd.bf16 %v1573_v31, %v3326_v19  ;;  %v3350_v45 = vpack.c.bf16 %v1469_v32, %v1465_v26 }
 0x243   : > { %v3352_v41 = vpack.c.bf16 %v1471_v42, %v1467_v56  ;;  %v1590_v33 = vadd.bf16 %v1574_v39, %v3331_v8 }
 0x244   : > { %v1605_v49 = vmul.bf16 1061961548, %v1589_v43  ;;  %v1543_v57 = vmul.bf16 %v3350_v45, %v3350_v45 }
 0x245   : > { %v1544_v35 = vmul.bf16 %v3352_v41, %v3352_v41  ;;  %v1474_v59 = vpop.f32.mrb[12].mxu1  ;;  %v1606_v10 = vmul.bf16 1061961548, %v1590_v33 }
 0x246   : > { %2608 = vtanh.bf16 %v1605_v49  ;;  %v1559_v54 = vmul.bf16 %v1543_v57, %v3350_v45  ;;  %v1476_v44 = vpop.f32.mrb[13].mxu1  ;;  %v1475_v22 = vadd.f32 %v1474_v59, %v1315_v61  ;;  %v1325_v59 = vpop.permute.xlu0 %1324 }
 0x247   : > { %v1560_v13 = vmul.bf16 %v1544_v35, %v3352_v41  ;;  %v1478_v17 = vpop.f32.mrb[14].mxu1  ;;  %2610 = vtanh.bf16 %v1606_v10  ;;  %v1477_v16 = vadd.f32 %v1476_v44, %v1315_v61 }
 0x248   : > { %v1575_v21 = vmul.bf16 1027030327, %v1559_v54  ;;  %v1479_v24 = vadd.f32 %v1478_v17, %v1320_v5  ;;  %v1480_v7 = vpop.f32.mrb[15].mxu1  ;;  %v1330_v54 = vpop.permute.xlu1 %1329 }
 0x249   : > { %v2605_v9 = vpop.eup %2604  ;;  %v1576_v28 = vmul.bf16 1027030327, %v1560_v13  ;;  %v1481_v25 = vadd.f32 %v1480_v7, %v1320_v5 }
 0x24a   : > { %v2607_v11 = vpop.eup %2606  ;;  %v1591_v30 = vadd.bf16 %v1575_v21, %v3350_v45  ;;  %v3362_v31 = vpack.c.bf16 %v1479_v24, %v1475_v22  ;;  %v1635_v26 = vadd.bf16 1065369472, %v2605_v9 }
 0x24b   : > { %v3364_v32 = vpack.c.bf16 %v1481_v25, %v1477_v16  ;;  %v1636_v38 = vadd.bf16 1065369472, %v2607_v11  ;;  %v1592_v39 = vadd.bf16 %v1576_v28, %v3352_v41 }
 0x24c   : > { %v1607_v56 = vmul.bf16 1061961548, %v1591_v30  ;;  %v1545_v42 = vmul.bf16 %v3362_v31, %v3362_v31  ;;  %v1651_v43 = vmul.bf16 1056980736, %v1635_v26 }
 0x24d   : > { %v1546_v33 = vmul.bf16 %v3364_v32, %v3364_v32  ;;  %v1484_v49 = vpop.f32.mrb[16].mxu1  ;;  %v1652_v57 = vmul.bf16 1056980736, %v1636_v38  ;;  %v1608_v35 = vmul.bf16 1061961548, %v1592_v39 }
 0x24e   : > { %2612 = vtanh.bf16 %v1607_v56  ;;  %v1561_v10 = vmul.bf16 %v1545_v42, %v3362_v31  ;;  %v1486_v61 = vpop.f32.mrb[17].mxu1  ;;  %v1485_v21 = vadd.f32 %v1484_v49, %v1325_v59  ;;  %v1667_v7 = vmul.bf16 %v1651_v43, %v3303_v34 }
 0x24f   : > { %v1562_v44 = vmul.bf16 %v1546_v33, %v3364_v32  ;;  %v1488_v5 = vpop.f32.mrb[18].mxu1  ;;  %v1668_v13 = vmul.bf16 %v1652_v57, %v3305_v23  ;;  %2614 = vtanh.bf16 %v1608_v35  ;;  %v1487_v16 = vadd.f32 %v1486_v61, %v1325_v59  ;;  %v1335_v59 = vpop.permute.xlu0 %1334 }
 0x250   : > { %v1577_v17 = vmul.bf16 1027030327, %v1561_v10  ;;  %v1489_v22 = vadd.f32 %v1488_v5, %v1330_v54  ;;  %v1490_v24 = vpop.f32.mrb[19].mxu1 }
 0x251   : > { %v2609_v9 = vpop.eup %2608  ;;  %v1578_v28 = vmul.bf16 1027030327, %v1562_v44  ;;  %v1491_v25 = vadd.f32 %v1490_v24, %v1330_v54  ;;  %1690 = vmatprep.subr.bf16.mxu0 %v1668_v13  ;;  %v1340_v54 = vpop.permute.xlu1 %1339 }
 0x252   : > { %v2611_v11 = vpop.eup %2610  ;;  %v1593_v30 = vadd.bf16 %v1577_v17, %v3362_v31  ;;  %v3376_v26 = vpack.c.bf16 %v1489_v22, %v1485_v21  ;;  %1691 = vmatpush1.bf16.msra.mxu0 %v1667_v7  ;;  %v1637_v38 = vadd.bf16 1065369472, %v2609_v9 }
 0x253   : > { %v3378_v23 = vpack.c.bf16 %v1491_v25, %v1487_v16  ;;  %v1638_v39 = vadd.bf16 1065369472, %v2611_v11  ;;  %v1594_v56 = vadd.bf16 %v1578_v28, %v3364_v32 }
 0x254   : > { %v1609_v42 = vmul.bf16 1061961548, %v1593_v30  ;;  %v1547_v34 = vmul.bf16 %v3376_v26, %v3376_v26  ;;  %v1653_v43 = vmul.bf16 1056980736, %v1637_v38 }
 0x255   : > { %v1548_v33 = vmul.bf16 %v3378_v23, %v3378_v23  ;;  %v1494_v49 = vpop.f32.mrb[20].mxu1  ;;  %v1654_v57 = vmul.bf16 1056980736, %v1638_v39  ;;  %v1610_v35 = vmul.bf16 1061961548, %v1594_v56 }
 0x256   : > { %2616 = vtanh.bf16 %v1609_v42  ;;  %v1563_v10 = vmul.bf16 %v1547_v34, %v3376_v26  ;;  %v1496_v61 = vpop.f32.mrb[21].mxu1  ;;  %v1495_v21 = vadd.f32 %v1494_v49, %v1335_v59  ;;  %v1669_v7 = vmul.bf16 %v1653_v43, %v3326_v19 }
 0x257   : > { %v1564_v44 = vmul.bf16 %v1548_v33, %v3378_v23  ;;  %v1498_v5 = vpop.f32.mrb[22].mxu1  ;;  %v1670_v13 = vmul.bf16 %v1654_v57, %v3331_v8  ;;  %2618 = vtanh.bf16 %v1610_v35  ;;  %v1497_v16 = vadd.f32 %v1496_v61, %v1335_v59  ;;  %v1345_v59 = vpop.permute.xlu0 %1344 }
 0x258   : > { %v1579_v17 = vmul.bf16 1027030327, %v1563_v10  ;;  %v1499_v22 = vadd.f32 %v1498_v5, %v1340_v54  ;;  %v1500_v24 = vpop.f32.mrb[23].mxu1 }
 0x259   : > { %v2613_v9 = vpop.eup %2612  ;;  %v1580_v28 = vmul.bf16 1027030327, %v1564_v44  ;;  %v1501_v25 = vadd.f32 %v1500_v24, %v1340_v54  ;;  %1692 = vmatprep.subr.bf16.mxu0 %v1670_v13  ;;  %v1350_v54 = vpop.permute.xlu1 %1349 }
 0x25a   : > { %v2615_v11 = vpop.eup %2614  ;;  %v1595_v30 = vadd.bf16 %v1579_v17, %v3376_v26  ;;  %v3390_v38 = vpack.c.bf16 %v1499_v22, %v1495_v21  ;;  %1693 = vmatpush1.bf16.msra.mxu0 %v1669_v7  ;;  %v1639_v39 = vadd.bf16 1065369472, %v2613_v9 }
 0x25b   : > { %v3392_v8 = vpack.c.bf16 %v1501_v25, %v1497_v16  ;;  %v1640_v56 = vadd.bf16 1065369472, %v2615_v11  ;;  %v1596_v42 = vadd.bf16 %v1580_v28, %v3378_v23 }
 0x25c   : > { %v1611_v34 = vmul.bf16 1061961548, %v1595_v30  ;;  %v1549_v19 = vmul.bf16 %v3390_v38, %v3390_v38  ;;  %v1655_v43 = vmul.bf16 1056980736, %v1639_v39 }
 0x25d   : > { %v1550_v33 = vmul.bf16 %v3392_v8, %v3392_v8  ;;  %v1504_v49 = vpop.f32.mrb[24].mxu1  ;;  %v1656_v57 = vmul.bf16 1056980736, %v1640_v56  ;;  %v1612_v35 = vmul.bf16 1061961548, %v1596_v42 }
 0x25e   : > { %2620 = vtanh.bf16 %v1611_v34  ;;  %v1565_v10 = vmul.bf16 %v1549_v19, %v3390_v38  ;;  %v1506_v61 = vpop.f32.mrb[25].mxu1  ;;  %v1505_v21 = vadd.f32 %v1504_v49, %v1345_v59  ;;  %v1671_v7 = vmul.bf16 %v1655_v43, %v3350_v45 }
 0x25f   : > { %v1566_v44 = vmul.bf16 %v1550_v33, %v3392_v8  ;;  %v1508_v5 = vpop.f32.mrb[26].mxu1  ;;  %v1672_v13 = vmul.bf16 %v1656_v57, %v3352_v41  ;;  %2622 = vtanh.bf16 %v1612_v35  ;;  %v1507_v16 = vadd.f32 %v1506_v61, %v1345_v59  ;;  %v1355_v59 = vpop.permute.xlu0 %1354 }
 0x260   : > { %v1581_v17 = vmul.bf16 1027030327, %v1565_v10  ;;  %v1509_v22 = vadd.f32 %v1508_v5, %v1350_v54  ;;  %v1510_v24 = vpop.f32.mrb[27].mxu1 }
 0x261   : > { %v2617_v9 = vpop.eup %2616  ;;  %v1582_v28 = vmul.bf16 1027030327, %v1566_v44  ;;  %v1511_v25 = vadd.f32 %v1510_v24, %v1350_v54  ;;  %1694 = vmatprep.subr.bf16.mxu0 %v1672_v13  ;;  %v1360_v54 = vpop.permute.xlu1 %1359 }
 0x262   : > { %v2619_v11 = vpop.eup %2618  ;;  %v1597_v30 = vadd.bf16 %v1581_v17, %v3390_v38  ;;  %v3404_v39 = vpack.c.bf16 %v1509_v22, %v1505_v21  ;;  %1695 = vmatpush1.bf16.msra.mxu0 %v1671_v7  ;;  %v1641_v56 = vadd.bf16 1065369472, %v2617_v9 }
 0x263   : > { %v3406_v41 = vpack.c.bf16 %v1511_v25, %v1507_v16  ;;  %v1642_v42 = vadd.bf16 1065369472, %v2619_v11  ;;  %v1598_v34 = vadd.bf16 %v1582_v28, %v3392_v8 }
 0x264   : > { %v1613_v19 = vmul.bf16 1061961548, %v1597_v30  ;;  %v1551_v45 = vmul.bf16 %v3404_v39, %v3404_v39  ;;  %v1657_v43 = vmul.bf16 1056980736, %v1641_v56 }
 0x265   : > { %v1552_v33 = vmul.bf16 %v3406_v41, %v3406_v41  ;;  %v1514_v49 = vpop.f32.mrb[28].mxu1  ;;  %v1658_v57 = vmul.bf16 1056980736, %v1642_v42  ;;  %v1614_v35 = vmul.bf16 1061961548, %v1598_v34 }
 0x266   : > { %2624 = vtanh.bf16 %v1613_v19  ;;  %v1567_v10 = vmul.bf16 %v1551_v45, %v3404_v39  ;;  %v1516_v61 = vpop.f32.mrb[29].mxu1  ;;  %v1515_v21 = vadd.f32 %v1514_v49, %v1355_v59  ;;  %v1673_v7 = vmul.bf16 %v1657_v43, %v3362_v31 }
 0x267   : > { %v1568_v44 = vmul.bf16 %v1552_v33, %v3406_v41  ;;  %v1518_v5 = vpop.f32.mrb[30].mxu1  ;;  %v1674_v13 = vmul.bf16 %v1658_v57, %v3364_v32  ;;  %2626 = vtanh.bf16 %v1614_v35  ;;  %v1517_v16 = vadd.f32 %v1516_v61, %v1355_v59 }
 0x268   : > { %v1583_v17 = vmul.bf16 1027030327, %v1567_v10  ;;  %v1519_v22 = vadd.f32 %v1518_v5, %v1360_v54  ;;  %v1520_v24 = vpop.f32.mrb[31].mxu1 }
 0x269   : > { %v2621_v9 = vpop.eup %2620  ;;  %v1584_v28 = vmul.bf16 1027030327, %v1568_v44  ;;  %v1521_v25 = vadd.f32 %v1520_v24, %v1360_v54  ;;  %1696 = vmatprep.subr.bf16.mxu0 %v1674_v13 }
 0x26a   : > { %v2623_v11 = vpop.eup %2622  ;;  %v1599_v30 = vadd.bf16 %v1583_v17, %v3404_v39  ;;  %v1537_v56 = vpack.c.bf16 %v1519_v22, %v1515_v21  ;;  %1697 = vmatpush1.bf16.msra.mxu0 %v1673_v7  ;;  %v1643_v42 = vadd.bf16 1065369472, %v2621_v9 }
 0x26b   : > { %v1538_v34 = vpack.c.bf16 %v1521_v25, %v1517_v16  ;;  %v1644_v32 = vadd.bf16 1065369472, %v2623_v11  ;;  %v1600_v19 = vadd.bf16 %v1584_v28, %v3406_v41 }
 0x26c   : > { %v1615_v45 = vmul.bf16 1061961548, %v1599_v30  ;;  %v1553_v33 = vmul.bf16 %v1537_v56, %v1537_v56  ;;  %v1659_v49 = vmul.bf16 1056980736, %v1643_v42 }
 0x26d   : > { %v1554_v57 = vmul.bf16 %v1538_v34, %v1538_v34  ;;  %v1660_v31 = vmul.bf16 1056980736, %v1644_v32  ;;  %v1616_v43 = vmul.bf16 1061961548, %v1600_v19 }
 0x26e   : > { %2628 = vtanh.bf16 %v1615_v45  ;;  %v1569_v35 = vmul.bf16 %v1553_v33, %v1537_v56  ;;  %v1675_v54 = vmul.bf16 %v1659_v49, %v3376_v26 }
 0x26f   : > { %v1570_v59 = vmul.bf16 %v1554_v57, %v1538_v34  ;;  %v1676_v10 = vmul.bf16 %v1660_v31, %v3378_v23  ;;  %2630 = vtanh.bf16 %v1616_v43 }
 0x270   : > { %v1585_v61 = vmul.bf16 1027030327, %v1569_v35 }
 0x271   : > { %v2625_v44 = vpop.eup %2624  ;;  %v1586_v5 = vmul.bf16 1027030327, %v1570_v59  ;;  %1698 = vmatprep.subr.bf16.mxu0 %v1676_v10  ;;  %v1683_v10 = vld [vmem:[%s3591_s10] sm:$0xf] }
 0x272   : > { %v2627_v13 = vpop.eup %2626  ;;  %v1601_v17 = vadd.bf16 %v1585_v61, %v1537_v56  ;;  %1699 = vmatpush1.bf16.msra.mxu0 %v1675_v54  ;;  %v1645_v21 = vadd.bf16 1065369472, %v2625_v44 }
 0x273   : > { %v1646_v22 = vadd.bf16 1065369472, %v2627_v13  ;;  %v1602_v24 = vadd.bf16 %v1586_v5, %v1538_v34 }
 0x274   : > { %v1617_v7 = vmul.bf16 1061961548, %v1601_v17  ;;  %v1661_v9 = vmul.bf16 1056980736, %v1645_v21 }
 0x275   : > { %v1662_v28 = vmul.bf16 1056980736, %v1646_v22  ;;  %v1618_v16 = vmul.bf16 1061961548, %v1602_v24 }
 0x276   : > { %2632 = vtanh.bf16 %v1617_v7  ;;  %v1677_v25 = vmul.bf16 %v1661_v9, %v3390_v38 }
 0x277   : > { %v1678_v23 = vmul.bf16 %v1662_v28, %v3392_v8  ;;  %2634 = vtanh.bf16 %v1618_v16 }
 0x279   : > { %v2629_v26 = vpop.eup %2628  ;;  %1700 = vmatprep.subr.bf16.mxu0 %v1678_v23 }
 0x27a   : > { %v2631_v11 = vpop.eup %2630  ;;  %1701 = vmatpush1.bf16.msra.mxu0 %v1677_v25  ;;  %v1647_v30 = vadd.bf16 1065369472, %v2629_v26 }
 0x27b   : > { %v1648_v42 = vadd.bf16 1065369472, %v2631_v11 }
 0x27c   : > { %v1663_v32 = vmul.bf16 1056980736, %v1647_v30 }
 0x27d   : > { %v1664_v19 = vmul.bf16 1056980736, %v1648_v42 }
 0x27e   : > { %v1679_v33 = vmul.bf16 %v1663_v32, %v3404_v39 }
 0x27f   : > { %v1680_v45 = vmul.bf16 %v1664_v19, %v3406_v41 }
 0x281   : > { %v2633_v49 = vpop.eup %2632  ;;  %1702 = vmatprep.subr.bf16.mxu0 %v1680_v45 }
 0x282   : > { %v2635_v57 = vpop.eup %2634  ;;  %1703 = vmatpush1.bf16.msra.mxu0 %v1679_v33  ;;  %v1649_v8 = vadd.bf16 1065369472, %v2633_v49 }
 0x283   : > { %v1650_v31 = vadd.bf16 1065369472, %v2635_v57 }
 0x284   : > { %v1665_v43 = vmul.bf16 1056980736, %v1649_v8 }
 0x285   : > { %v1666_v38 = vmul.bf16 1056980736, %v1650_v31 }
 0x286   : > { %v1681_v59 = vmul.bf16 %v1665_v43, %v1537_v56 }
 0x287   : > { %v1682_v35 = vmul.bf16 %v1666_v38, %v1538_v34 }
 0x289   : > { %1704 = vmatprep.subr.bf16.mxu0 %v1682_v35 }
 0x28a   : > { %1705 = vmatpush1.bf16.msra.mxu0 %v1681_v59 }
 0x28b   : > { %1834 = vmatprep.subr.bf16.mxu0 %v3202_v47  ;;  %v2550_v47 = vld [vmem:[%s3593_s12] sm:$0xff]  }
 0x28d   : > { %1723 = vmatmul.mubr.bf16.vlgmr.msra.gmra.mrb[4].mxu0 %v1683_v10 }
 0x28e   : > { %1835 = vmatpush1.bf16.msra.mxu0 %v3207_v58  ;;  %1866 = vmatprep.mubr.bf16.mxu0 %v2716_v3  ;;  %v2551_v58 = vld [vmem:[%s3593_s12 + $0x8] sm:$0xff]  }
 0x28f   : > { %1836 = vmatprep.subr.bf16.mxu0 %v3212_v63  ;;  %v2558_v63 = vld [vmem:[%s2937_s18 + $0x58] sm:$0xff]  }
 0x290   : > { %2466 = vmatprep.subr.bf16.mxu1 %v2558_v63 }
 0x292   : > { %1837 = vmatpush1.bf16.msra.mxu0 %v3219_v14  ;;  %v2559_v14 = vld [vmem:[%s2937_s18 + $0x18] sm:$0xff]  }
 0x293   : > { %1838 = vmatprep.subr.bf16.mxu0 %v3230_v27  ;;  %v2560_v27 = vld [vmem:[%s2937_s18 + $0x60] sm:$0xff]   ;;  %2474 = vmatpush3.bf16.msra.mxu1 %v2559_v14 }
 0x294   : > { %2467 = vmatprep.subr.bf16.mxu1 %v2560_v27 }
 0x296   : > { %1839 = vmatpush1.bf16.msra.mxu0 %v3237_v37  ;;  %v2561_v37 = vld [vmem:[%s2937_s18 + $0x20] sm:$0xff]  }
 0x297   : > { %1840 = vmatprep.subr.bf16.mxu0 %v3242_v55  ;;  %v2562_v55 = vld [vmem:[%s2937_s18 + $0x68] sm:$0xff]   ;;  %2475 = vmatpush3.bf16.msra.mxu1 %v2561_v37 }
 0x298   : > { %2468 = vmatprep.subr.bf16.mxu1 %v2562_v55 }
 0x29a   : > { %1841 = vmatpush1.bf16.msra.mxu0 %v3244_v60  ;;  %v2563_v60 = vld [vmem:[%s2937_s18 + $0x28] sm:$0xff]  }
 0x29b   : > { %1842 = vmatprep.subr.bf16.mxu0 %v3248_v62  ;;  %v2564_v62 = vld [vmem:[%s2937_s18 + $0x70] sm:$0xff]   ;;  %2476 = vmatpush3.bf16.msra.mxu1 %v2563_v60 }
 0x29c   : > { %2469 = vmatprep.subr.bf16.mxu1 %v2564_v62 }
 0x29e   : > { %1843 = vmatpush1.bf16.msra.mxu0 %v3251_v20  ;;  %v2565_v20 = vld [vmem:[%s2937_s18 + $0x30] sm:$0xff]  }
 0x29f   : > { %1844 = vmatprep.subr.bf16.mxu0 %v3254_v0  ;;  %2477 = vmatpush3.bf16.msra.mxu1 %v2565_v20  ;;  %v2566_v0 = vld [vmem:[%s2937_s18 + $0x78] sm:$0xff]  }
 0x2a0   : > { %2470 = vmatprep.subr.bf16.mxu1 %v2566_v0 }
 0x2a2   : > { %1845 = vmatpush1.bf16.msra.mxu0 %v3257_v1  ;;  %v2567_v1 = vld [vmem:[%s2937_s18 + $0x38] sm:$0xff]   ;;  %s626_s18 = sand.u32 1, %s2698_s22  }
 0x2a3   : > { %1846 = vmatprep.subr.bf16.mxu0 %v3260_v51  ;;  %2478 = vmatpush3.bf16.msra.mxu1 %v2567_v1  ;;  %v1731_v51 = vld [vmem:[%s682_s25] sm:$0x3]  ;;  %s2371_s27 = sshll.u32 %s626_s18, 4  ;;  %s3527_s28 = scalar_lea.sflag [#allocation3], %s626_s18 }
 0x2a4   : > { %vm1732_vm1 = vcmp.gt.f32.partialorder %v1731_v51, 0.5  ;;  %s3490_s29 = scalar_lea.vmem [#allocation2], %s2371_s27  ;;  %s2642_s25 = scalar_lea.vmem %s2641_s23, 512 }
 0x2a5   : > { %s2130_s30 = sshll.u32 %s3490_s29, 4  ;;  %s3523_s30 = int_to_ptr.vmem [resolvable:$true] %s2130_s30 }
 0x2a6   : > { %1847 = vmatpush1.bf16.msra.mxu0 %v3263_v15  ;;  %v1733_v15 = vsel %vm1732_vm1, 1, %v2716_v3  ;;  %s2636_s19 = scalar_lea.vmem %s3523_s30, 256  ;;  %p2643_p1 = scmp.lt.s32.totalorder %s3523_s30, %s2641_s23 }
 0x2a7   : > { %1848 = vmatprep.subr.bf16.mxu0 %v3266_v12  ;;  %v1737_v12 = vrot.slane %v1733_v15, %v3112_v48  ;;  %p2637_p12 = scmp.ne.s32.totalorder %s3523_s30, %s2636_s19  ;;  %p2644_p2 = scmp.lt.s32.totalorder %s2642_s25, %s2636_s19 }
 0x2a9   : > { %vm1742_vm2 = vcmp.eq.s32.totalorder %v1737_v12, 1  ;;  %p2638_p13 = pnand %p2637_p12, %p2848_p4  ;;  %p2645_p3 = por %p2644_p2, %p2643_p1 }
 0x2aa   : > { %1849 = vmatpush1.bf16.msra.mxu0 %v3269_v6  ;;  %v1741_v6 = vrot.slane %v1733_v15, %v910_v50 }
 0x2ab   : > { %2431 = vmatprep.subr.bf16.mxu0 %v3312_v40  ;;  %v1688_v40 = vpop.permute.xlu0 %1687  ;;  %p2639_p0 = pneg %p2638_p13 }
 0x2ac   : > { %vm1743_vm3 = vcmp.eq.s32.totalorder %v1741_v6, 1 }
 0x2ad   : > { %1867 = vmatmul.mubr.bf16.vlgmr.msra.gmra.mrb[8].mxu0 %v2550_v47  ;;  %p2646_p5 = pnand %p2645_p3, %p2639_p0 }
 0x2ae   : > { %1876 = vmatprep.mubr.bf16.mxu0 %v2716_v3  ;;  %2432 = vmatpush3.bf16.msra.mxu0 %v3316_v46 }
 0x2af   : > { %2433 = vmatprep.subr.bf16.mxu0 %v3321_v52 }
 0x2b2   : > { %2434 = vmatpush3.bf16.msra.mxu0 %v3329_v18 }
 0x2b3   : > { %2435 = vmatprep.subr.bf16.mxu0 %v3335_v53 }
 0x2b5   : > { %1877 = vmatmul.mubr.bf16.gmra.mrb[12].mxu0 %v2551_v58 }
 0x2b6   : > { %2436 = vmatpush3.bf16.msra.mxu0 %v3345_v29 }
 0x2b7   : > { %2437 = vmatprep.subr.bf16.mxu0 %v2558_v63 }
 0x2ba   : > { %2438 = vmatpush3.bf16.msra.mxu0 %v2559_v14 }
 0x2bb   : > { %2439 = vmatprep.subr.bf16.mxu0 %v2560_v27 }
 0x2be   : > { %2440 = vmatpush3.bf16.msra.mxu0 %v2561_v37 }
 0x2bf   : > { %2441 = vmatprep.subr.bf16.mxu0 %v2562_v55 }
 0x2c2   : > { %2442 = vmatpush3.bf16.msra.mxu0 %v2563_v60 }
 0x2c3   : > { %2443 = vmatprep.subr.bf16.mxu0 %v2564_v62 }
 0x2c6   : > { %2444 = vmatpush3.bf16.msra.mxu0 %v2565_v20 }
 0x2c7   : > { %2445 = vmatprep.subr.bf16.mxu0 %v2566_v0 }
 0x2ca   : > { %2446 = vmatpush3.bf16.msra.mxu0 %v2567_v1 }
 0x360   : > { %v1724_v46 = vpop.f32.mrb[4].mxu0 }
 0x361   : > { %v1725_v52 = vadd.f32 %v1724_v46, %v1688_v40  ;;  %v1726_v18 = vpop.f32.mrb[5].mxu0 }
 0x362   : > { %v1727_v53 = vadd.f32 %v1726_v18, %v1688_v40  ;;  %v1728_v29 = vpop.f32.mrb[6].mxu0 }
 0x363   : > { %v1744_v39 = vsel %vm1742_vm2, -inf, %v1725_v52  ;;  %v1729_v41 = vpop.f32.mrb[7].mxu0 }
 0x364   : > { %v1745_v56 = vsel %vm1743_vm3, -inf, %v1727_v53 }
 0x365   : > { %v1748_v3 = vcombine.low %v1744_v39, %v1745_v56  ;;  %v1749_v34 = vcombine.high %v1744_v39, %v1745_v56 }
 0x367   : > { %v1756_v48 = vrot.slane %v1748_v3, %v3095_v36  ;;  %v1763_v4 = vrot.slane %v1749_v34, %v3095_v36 }
 0x369   : > { %v1764_v61 = vcombine.high %v1756_v48, %v1756_v48  ;;  %v1765_v54 = vcombine.high %v1763_v4, %v1763_v4  ;;  %v1772_v44 = vrot.slane %v1756_v48, %v3095_v36  ;;  %v1779_v5 = vrot.slane %v1763_v4, %v3095_v36 }
 0x36b   : > { %v1786_v13 = vrot.slane %v1764_v61, %v3095_v36  ;;  %v1793_v17 = vrot.slane %v1765_v54, %v3095_v36  ;;  %v1794_v21 = vcombine.high %v1772_v44, %v1772_v44  ;;  %v1795_v22 = vcombine.high %v1779_v5, %v1779_v5  ;;  %1810 = vst.msk [vmem:[%s3490_s29] sm:$0x3] %vm3482_vm4, %v1772_v44 }
 0x36c   : > { %1814 = vst.msk [vmem:[%s3490_s29 + $0x8] sm:$0x3] %vm3482_vm4, %v1779_v5 }
 0x36d   : > { %v1796_v2 = vcombine.high %v1786_v13, %v1786_v13  ;;  %v1797_v36 = vcombine.high %v1793_v17, %v1793_v17  ;;  %1811 = vst.msk [vmem:[%s3490_s29 + $0x2] sm:$0x3] %vm3482_vm4, %v1786_v13  ;;  %1812 = vst.msk [vmem:[%s3490_s29 + $0x4] sm:$0x3] %vm3482_vm4, %v1794_v21 }
 0x36e   : > { %1815 = vst.msk [vmem:[%s3490_s29 + $0xa] sm:$0x3] %vm3482_vm4, %v1793_v17  ;;  %1816 = vst.msk [vmem:[%s3490_s29 + $0xc] sm:$0x3] %vm3482_vm4, %v1795_v22 }
 0x36f   : > { %1813 = vst.msk [vmem:[%s3490_s29 + $0x6] sm:$0x3] %vm3482_vm4, %v1796_v2  ;;  %1817 = vst.msk [vmem:[%s3490_s29 + $0xe] sm:$0x3] %vm3482_vm4, %v1797_v36 }
 0x380   : > { %v1868_v24 = vpop.f32.mrb[8].mxu0 }
 0x381   : > { %v1870_v7 = vpop.f32.mrb[9].mxu0 }
 0x382   : > { %v1872_v9 = vpop.f32.mrb[10].mxu0 }
 0x383   : > { %v1887_v28 = vpack.c.bf16 %v1872_v9, %v1868_v24  ;;  %v1874_v16 = vpop.f32.mrb[11].mxu0 }
 0x384   : > { %v1888_v23 = vpack.c.bf16 %v1874_v16, %v1870_v7 }
 0x386   : > { %2075 = vmatprep.mubr.bf16.mxu0 %v1888_v23 }
 0x387   : > { %2076 = vmatmul.mubr.bf16.vlgmr.msra.gmra.mrb[16].mxu0 %v1887_v28 }
 0x388   : > { %v1878_v25 = vpop.f32.mrb[12].mxu0 }
 0x389   : > { %v1880_v26 = vpop.f32.mrb[13].mxu0 }
 0x38a   : > { %v1882_v11 = vpop.f32.mrb[14].mxu0 }
 0x38b   : > { %v1889_v30 = vpack.c.bf16 %v1882_v11, %v1878_v25  ;;  %v1884_v42 = vpop.f32.mrb[15].mxu0 }
 0x38c   : > { %v1890_v32 = vpack.c.bf16 %v1884_v42, %v1880_v26 }
 0x38e   : > { %2083 = vmatprep.mubr.bf16.mxu1 %v1890_v32 }
 0x38f   : > { %2084 = vmatmul.mubr.bf16.vlgmr.msra.gmra.mrb[32].mxu1 %v1889_v30 }
 0x390   : > { %2649 = shalt.err (!%p2646_p5)
}
 0x391   : > { %s2650_s18 = scalar_lea.hbm %s3521_s15, 256  ;;  %s2654_s1 = scalar_lea.hbm %s3595_s14, 512 }
 0x392   : > { %p2651_p6 = scmp.ne.s32.totalorder %s3521_s15, %s2650_s18  ;;  %p2655_p10 = scmp.lt.u32.totalorder %s3521_s15, %s3595_s14 }
 0x393   : > { %p2656_p11 = scmp.lt.u32.totalorder %s2654_s1, %s2650_s18  ;;  %p2658_p13 = scmp.lt.u32.totalorder %s2650_s18, %s3521_s15 }
 0x394   : > { %p2652_p7 = pnand %p2651_p6, %p2848_p4 }
 0x395   : > { %p2657_p12 = por %p2656_p11, %p2655_p10 }
 0x396   : > { %p2653_p9 = pneg %p2652_p7 }
 0x397   : > { %p2659_p0 = por %p2658_p13, %p2657_p12 }
 0x399   : > { %p2660_p1 = pnand %p2659_p0, %p2653_p9 }
 0x39b   : > { %2663 = shalt.err (!%p2660_p1)
}
 0x39c   : > { %s2721_s19 = smov 32   ;;  %s2722_s24 = smov 2   ;;  %v1930_v57 = vpop.permute.xlu1 %1929  ;;  %v1935_v38 = vpop.permute.xlu0 %1934 }
 0x39d   : > { %2479 = dma.vmem_to_hbm [thread:$0]  (%p2848_p4), %s3523_s30, 256, %s3521_s15, %s3527_s28, %s2721_s19, %s2721_s19, %s2722_s24  }
 0x39e   : > { %s2428_s23 = sshll.u32 %s2886_s17, 5  ;;  %s3620_s27 = sld [smem:[#allocation13_spill]] }
 0x3a0   : > { %v1940_v63 = vpop.permute.xlu1 %1939  ;;  %v1945_v55 = vpop.permute.xlu0 %1944 }
 0x3a4   : > { %s696_s29 = scalar_lea.vmem %s3620_s27, %s2428_s23 }
 0x45a   : > { %v2447_v19 = vpop.f32.mrb[16].mxu0 }
 0x45b   : > { %v2448_v45 = vpop.f32.mrb[17].mxu0 }
 0x45c   : > { %v2449_v33 = vadd.f32 %v2448_v45, %v2447_v19  ;;  %v2450_v49 = vpop.f32.mrb[18].mxu0 }
 0x45d   : > { %v2451_v8 = vpop.f32.mrb[19].mxu0 }
 0x45e   : > { %v2078_v31 = vadd.f32 %v2449_v33, %v1930_v57  ;;  %v2452_v43 = vadd.f32 %v2451_v8, %v2450_v49 }
 0x460   : > { %2092 = vst.msk [vmem:[%s696_s29] sm:$0xff] %vm742_vm14, %v2078_v31  ;;  %v2081_v35 = vadd.f32 %v2452_v43, %v1935_v38 }
 0x462   : > { %2093 = vst.msk [vmem:[%s696_s29 + $0x8] sm:$0xff] %vm742_vm14, %v2081_v35  ;;  %v2453_v59 = vpop.f32.mrb[32].mxu1 }
 0x463   : > { %v2454_v10 = vpop.f32.mrb[33].mxu1 }
 0x464   : > { %v2455_v47 = vadd.f32 %v2454_v10, %v2453_v59  ;;  %v2456_v58 = vpop.f32.mrb[34].mxu1 }
 0x465   : > { %v2457_v14 = vpop.f32.mrb[35].mxu1 }
 0x466   : > { %v2086_v27 = vadd.f32 %v2455_v47, %v1940_v63  ;;  %v2458_v37 = vadd.f32 %v2457_v14, %v2456_v58 }
 0x468   : > { %2094 = vst.msk [vmem:[%s696_s29 + $0x10] sm:$0xff] %vm742_vm14, %v2086_v27  ;;  %v2089_v60 = vadd.f32 %v2458_v37, %v1945_v55 }
 0x46a   : > { %2095 = vst.msk [vmem:[%s696_s29 + $0x18] sm:$0xff] %vm742_vm14, %v2089_v60 }
 0x46b PF: > { %s3621_s0 = sld [smem:[#allocation5_spill]]  ;;  %p2485_p4 = scmp.ge.s32.totalorder %s2714_s26, 2 }
 0x46d   : > { %p2482_p2 = pnand %p2485_p4, %p2855_p8 }
 0x471   : > { %s2151_s30 = sand.u32 1, %s3621_s0  }
 0x472   : > { %s2152_s15 = scalar_lea.sflag [#allocation3], %s2151_s30 }
 0x473   : > { %2689 = dma.done.wait (!%p2482_p2), %s2152_s15, 256  }
 0x474   : > { %2691 = vsyncadd (!%p2482_p2), %s2152_s15, 4294967040  ;;  %s30_s26 = sadd.s32 1, %s2714_s26   ;;  %s3623_s28 = sld [smem:[#allocation6_spill]] }
 0x475   : > { %p27_p3 = scmp.ge.s32.totalorder %s30_s26, 4   ;;  %s3624_s23 = sld [smem:[#allocation10_spill]] }
 0x476   : > { %s3625_s24 = sld [smem:[#allocation7_spill]]  ;;  %s3626_s25 = sld [smem:[#allocation8_spill]] }
 0x477   : > { %s3627_s21 = smov %s2698_s22  ;;  %29 = sbr.rel (!%p27_p3) target bundleno = 8 (0x8), region = 150 }
 0x47a   : > { %s3628_s22 = smov %s3623_s28 }
 0x47e   :  { %2181 = vsyncpa [#allocation3], 1 }
 0x47f   :  { %2183 = vsyncpa [#allocation3 + $0x1], 1 }

</bundles_post_ra>
